<compile_context>
chip_gen: v7x
topology: tpu7x:2x2x1
jax: 0.10.0
libtpu: 0.0.40
codegen_flags: <defaults>
</compile_context>

<pallas_src>
import functools

import jax
import jax.numpy as jnp
from jax.experimental import pallas as pl
from jax.experimental.pallas import tpu as pltpu


def _round_up(x, m):
    return (x + m - 1) // m * m


def _node_update_kernel(*refs, use_norm, pre_scale, use_act, concat,
                        out_feats, aligned_split):
    if use_norm:
        h_ref, norm_ref, w_ref, b_ref, out_ref = refs
    else:
        h_ref, w_ref, b_ref, out_ref = refs
        norm_ref = None

    x = h_ref[...]
    if use_norm and pre_scale:
        # Scale the narrow [tile_m, in_feats] operand before the MXU.
        x = x * norm_ref[...].astype(x.dtype)

    # Native-dtype operands straight into the MXU; f32 accumulation.
    y = jnp.dot(x, w_ref[...], preferred_element_type=jnp.float32)

    if use_norm and not pre_scale:
        # norm * (h @ W) == (norm * h) @ W; scale the narrower output side.
        y = y * norm_ref[...].astype(jnp.float32)
    y = y + b_ref[...].astype(jnp.float32)

    if concat:
        act_y = jnp.maximum(y, 0.0) if use_act else y
        if aligned_split:
            # Lane-aligned split point -> two clean sliced stores.
            out_ref[:, :out_feats] = y.astype(out_ref.dtype)
            out_ref[:, out_feats:] = act_y.astype(out_ref.dtype)
        else:
            # Non-aligned split: build the tile in-register, store once.
            out_ref[...] = jnp.concatenate([y, act_y], axis=-1).astype(out_ref.dtype)
    else:
        if use_act:
            y = jnp.maximum(y, 0.0)
        out_ref[...] = y.astype(out_ref.dtype)


def _choose_tile_m(n_rows, tile_m_req, sub):
    """MXU-friendly row tile: multiples of 256; only the last block is short."""
    mxu_m = 256
    tm = max(mxu_m, _round_up(int(tile_m_req), mxu_m))
    if n_rows <= tm:
        if n_rows > mxu_m:
            # Keep >=2 grid steps so both v7x TensorCores get work.
            tm = _round_up(pl.cdiv(n_rows, 2), mxu_m)
        else:
            tm = min(_round_up(n_rows, sub), mxu_m)
    return tm


def node_update(h, w, b, norm=None, *, test=False, activation=True,
                concat=False, tile_m=512):
    """Pallas NodeUpdate forward.

    h:    [N, in_feats]          node features
    w:    [in_feats, out_feats]  (== PyTorch linear.weight.T)
    b:    [out_feats]
    norm: [N, 1]                 per-node normalization (required when test=True)
    returns [N, out_feats] (or [N, 2*out_feats] when concat=True)
    """
    N, in_feats = h.shape
    assert w.shape[0] == in_feats
    out_feats = w.shape[1]
    if test:
        assert norm is not None and norm.shape == (N, 1)

    dtype = h.dtype
    itemsize = jnp.dtype(dtype).itemsize
    w_itemsize = jnp.dtype(w.dtype).itemsize
    sub = 8 if itemsize >= 4 else 16

    out_cols = 2 * out_feats if concat else out_feats
    pre_scale = bool(test and out_cols > in_feats)   # scale the narrower side
    aligned_split = (out_feats % 128 == 0)

    tm = _choose_tile_m(N, tile_m, sub)
    n_blocks = pl.cdiv(N, tm)

    # Bias as a 2-D f32 row (small, VMEM-resident).
    b2 = b.reshape(1, out_feats).astype(jnp.float32)

    inputs = [h]
    in_specs = [pl.BlockSpec((tm, in_feats), lambda i: (i, 0))]
    if test:
        inputs.append(norm.astype(jnp.float32))
        in_specs.append(pl.BlockSpec((tm, 1), lambda i: (i, 0)))
    inputs += [w, b2]
    # Constant index_map => these can be single-buffered.
    resident = [
        dict(block_shape=(in_feats, out_feats), index_map=lambda i: (0, 0)),
        dict(block_shape=(1, out_feats), index_map=lambda i: (0, 0)),
    ]

    kernel = functools.partial(
        _node_update_kernel, use_norm=test, pre_scale=pre_scale,
        use_act=activation, concat=concat, out_feats=out_feats,
        aligned_split=aligned_split)

    # Advisory cost estimate (un-padded streamed bytes + matmul FLOPs).
    bytes_accessed = (N * in_feats * itemsize
                      + in_feats * out_feats * w_itemsize
                      + out_feats * 4
                      + N * out_cols * itemsize
                      + (N * 4 if test else 0))
    cost = pl.CostEstimate(flops=2 * N * in_feats * out_feats,
                           transcendentals=0,
                           bytes_accessed=bytes_accessed)

    # VMEM budget: double-buffered h/norm/out tiles + single-buffered W/b.
    lane = 128
    pc = lambda c: _round_up(c, lane)
    vmem_need = (2 * tm * pc(in_feats) * itemsize              # h   (x2 buffers)
                 + 2 * tm * pc(out_cols) * itemsize            # out (x2 buffers)
                 + (2 * tm * lane * 4 if test else 0)          # norm(x2 buffers)
                 + _round_up(in_feats, sub) * pc(out_feats) * w_itemsize  # W (x1)
                 + 8 * pc(out_feats) * 4)                      # bias     (x1)
    vmem_cap = 64 * 1024 * 1024
    try:
        vmem_cap = int(getattr(pltpu.get_tpu_info(), "vmem_capacity_bytes",
                               vmem_cap))
    except Exception:
        pass
    vmem_limit = int(min(max(2 * vmem_need + (2 << 20), 8 << 20),
                         int(0.85 * vmem_cap)))

    out_shape = jax.ShapeDtypeStruct((N, out_cols), dtype)
    out_spec = pl.BlockSpec((tm, out_cols), lambda i: (i, 0))
    cparams = pltpu.CompilerParams(
        dimension_semantics=("parallel",),         # megacore-shardable row axis
        vmem_limit_bytes=vmem_limit)

    def _run(single_buffer_weights):
        if single_buffer_weights:
            extra = [pl.BlockSpec(s["block_shape"], s["index_map"],
                                  pipeline_mode=pl.Buffered(1))
                     for s in resident]
        else:
            extra = [pl.BlockSpec(s["block_shape"], s["index_map"])
                     for s in resident]
        return pl.pallas_call(
            kernel,
            out_shape=out_shape,
            grid_spec=pltpu.PrefetchScalarGridSpec(
                num_scalar_prefetch=0,
                grid=(n_blocks,),
                in_specs=in_specs + extra,
                out_specs=out_spec),
            compiler_params=cparams,
            cost_estimate=cost,
        )(*inputs)

    # TODO(synk): for very large in/out feature dims (v7x 64 MiB VMEM), add K/N
    # grid tiling with a VMEM f32 accumulator instead of keeping W resident.
    try:
        return _run(single_buffer_weights=True)
    except Exception:
        # Fallback for JAX builds that reject BlockSpec(pipeline_mode=Buffered(1)).
        return _run(single_buffer_weights=False)


def node_update_ref(h, w, b, norm=None, *, test=False, activation=True,
                    concat=False):
    x = h * norm if test else h
    y = x @ w + b
    if concat:
        a = jnp.maximum(y, 0.0) if activation else y
        return jnp.concatenate([y, a], axis=1)
    if activation:
        y = jnp.maximum(y, 0.0)
    return y


if __name__ == "__main__":
    key = jax.random.PRNGKey(0)
    k_h, k_n, k_w, k_b = jax.random.split(key, 4)

    # Shapes that exercise the ragged last row block (300 = 256 + 44) and a
    # non-128-aligned output width (96).
    N, in_feats, out_feats = 300, 64, 96

    h = jax.random.normal(k_h, (N, in_feats), dtype=jnp.float32)
    norm = jax.random.uniform(k_n, (N, 1), dtype=jnp.float32,
                              minval=0.1, maxval=1.0)

    # nn.Linear-style init; weight stored pre-transposed as [in_feats, out_feats].
    bound = 1.0 / (in_feats ** 0.5)
    w_t = jax.random.uniform(k_w, (in_feats, out_feats), dtype=jnp.float32,
                             minval=-bound, maxval=bound)
    b = jax.random.uniform(k_b, (out_feats,), dtype=jnp.float32,
                           minval=-bound, maxval=bound)

    tol = dict(atol=2e-3, rtol=2e-3)   # MXU default precision (bf16 passes)

    # --- test=True path (norm applied on the narrow side), ReLU.
    out = jax.block_until_ready(
        node_update(h, w_t, b, norm, test=True, activation=True, concat=False))
    ref = node_update_ref(h, w_t, b, norm, test=True, activation=True,
                          concat=False)
    assert out.shape == ref.shape
    assert jnp.allclose(out, ref, **tol), "test=True mismatch"

    # --- test=False path (norm never DMA'd), no activation.
    out2 = jax.block_until_ready(
        node_update(h, w_t, b, test=False, activation=False, concat=False))
    ref2 = node_update_ref(h, w_t, b, test=False, activation=False,
                           concat=False)
    assert jnp.allclose(out2, ref2, **tol), "test=False mismatch"

    # --- concat path, non-aligned split (in-kernel concatenate + single store).
    out3 = jax.block_until_ready(
        node_update(h, w_t, b, norm, test=True, activation=True, concat=True))
    ref3 = node_update_ref(h, w_t, b, norm, test=True, activation=True,
                           concat=True)
    assert out3.shape == ref3.shape
    assert jnp.allclose(out3, ref3, **tol), "concat (unaligned) mismatch"

    # --- concat path, 128-aligned split (lane-aligned sliced stores).
    k_w2, k_b2 = jax.random.split(k_w)
    out_feats2 = 128
    w2 = jax.random.uniform(k_w2, (in_feats, out_feats2), dtype=jnp.float32,
                            minval=-bound, maxval=bound)
    b2 = jax.random.uniform(k_b2, (out_feats2,), dtype=jnp.float32,
                            minval=-bound, maxval=bound)
    out4 = jax.block_until_ready(
        node_update(h, w2, b2, test=False, activation=True, concat=True))
    ref4 = node_update_ref(h, w2, b2, test=False, activation=True, concat=True)
    assert out4.shape == ref4.shape
    assert jnp.allclose(out4, ref4, **tol), "concat (aligned) mismatch"

    print("KERNEL_OK")
</pallas_src>

<mosaic_0001>
module attributes {stable_mosaic.version = 11 : i64} {
  func.func @_node_update_kernel(%arg0: i32, %arg1: memref<256x64xf32, #tpu.memory_space<vmem>>, %arg2: memref<256x1xf32, #tpu.memory_space<vmem>>, %arg3: memref<64x96xf32, #tpu.memory_space<vmem>>, %arg4: memref<1x96xf32, #tpu.memory_space<vmem>>, %arg5: memref<256x96xf32, #tpu.memory_space<vmem>>) attributes {dimension_semantics = [#tpu.dimension_semantics<parallel>], iteration_bounds = array<i64: 2>, scalar_prefetch = 0 : i64, scratch_operands = 0 : i64, tpu.core_type = #tpu.core_type<tc>, window_params = [{transform_indices = @transform_0, window_bounds = array<i64: 256, 64>}, {transform_indices = @transform_1, window_bounds = array<i64: 256, 1>}, {pipeline_mode = #tpu.pipeline_mode<synchronous>, transform_indices = @transform_2, window_bounds = array<i64: 64, 96>}, {pipeline_mode = #tpu.pipeline_mode<synchronous>, transform_indices = @transform_3, window_bounds = array<i64: 1, 96>}, {transform_indices = @transform_4, window_bounds = array<i64: 256, 96>}]} {
    %c0 = arith.constant 0 : index
    %c0_0 = arith.constant 0 : index
    %0 = vector.load %arg1[%c0, %c0_0] : memref<256x64xf32, #tpu.memory_space<vmem>>, vector<256x64xf32>
    %c0_1 = arith.constant 0 : index
    %c0_2 = arith.constant 0 : index
    %1 = vector.load %arg2[%c0_1, %c0_2] : memref<256x1xf32, #tpu.memory_space<vmem>>, vector<256x1xf32>
    %2 = vector.broadcast %1 : vector<256x1xf32> to vector<256x64xf32>
    %3 = arith.mulf %0, %2 : vector<256x64xf32>
    %c0_3 = arith.constant 0 : index
    %c0_4 = arith.constant 0 : index
    %4 = vector.load %arg3[%c0_3, %c0_4] : memref<64x96xf32, #tpu.memory_space<vmem>>, vector<64x96xf32>
    %cst = arith.constant dense<0.000000e+00> : vector<256x96xf32>
    %5 = tpu.matmul %3, %4, %cst {dimension_numbers = #tpu.dot_dimension_numbers<[1], [0], [0], [1], [0, 0, 1, 1], [], []>} : vector<256x64xf32>, vector<64x96xf32>, vector<256x96xf32> -> vector<256x96xf32>
    %c0_5 = arith.constant 0 : index
    %c0_6 = arith.constant 0 : index
    %6 = vector.load %arg4[%c0_5, %c0_6] : memref<1x96xf32, #tpu.memory_space<vmem>>, vector<1x96xf32>
    %7 = vector.broadcast %6 : vector<1x96xf32> to vector<256x96xf32>
    %8 = arith.addf %5, %7 : vector<256x96xf32>
    %cst_7 = arith.constant 0.000000e+00 : f32
    %9 = vector.broadcast %cst_7 : f32 to vector<256x96xf32>
    %10 = arith.maximumf %8, %9 : vector<256x96xf32>
    %c0_8 = arith.constant 0 : index
    %c0_9 = arith.constant 0 : index
    %11 = vector.load %arg5[%c0_8, %c0_9] : memref<256x96xf32, #tpu.memory_space<vmem>>, vector<256x96xf32>
    tpu.vector_store %arg5[%c0_8, %c0_9], %10 {strides = array<i32>} : memref<256x96xf32, #tpu.memory_space<vmem>>, vector<256x96xf32>,
    return
  }
  func.func @transform_0(%arg0: i32) -> (i32, i32) {
    %c0_i32 = arith.constant 0 : i32
    %c0_i32_0 = arith.constant 0 : i32
    return %arg0, %c0_i32 : i32, i32
  }
  func.func @transform_1(%arg0: i32) -> (i32, i32) {
    %c0_i32 = arith.constant 0 : i32
    %c0_i32_0 = arith.constant 0 : i32
    return %arg0, %c0_i32 : i32, i32
  }
  func.func @transform_2(%arg0: i32) -> (i32, i32) {
    %c0_i32 = arith.constant 0 : i32
    %c0_i32_0 = arith.constant 0 : i32
    %c0_i32_1 = arith.constant 0 : i32
    return %c0_i32, %c0_i32_0 : i32, i32
  }
  func.func @transform_3(%arg0: i32) -> (i32, i32) {
    %c0_i32 = arith.constant 0 : i32
    %c0_i32_0 = arith.constant 0 : i32
    %c0_i32_1 = arith.constant 0 : i32
    return %c0_i32, %c0_i32_0 : i32, i32
  }
  func.func @transform_4(%arg0: i32) -> (i32, i32) {
    %c0_i32 = arith.constant 0 : i32
    %c0_i32_0 = arith.constant 0 : i32
    return %arg0, %c0_i32 : i32, i32
  }
}

module attributes {stable_mosaic.version = 11 : i64} {
  func.func @_node_update_kernel(%arg0: i32, %arg1: memref<256x64xf32, #tpu.memory_space<vmem>>, %arg2: memref<256x1xf32, #tpu.memory_space<vmem>>, %arg3: memref<64x96xf32, #tpu.memory_space<vmem>>, %arg4: memref<1x96xf32, #tpu.memory_space<vmem>>, %arg5: memref<256x96xf32, #tpu.memory_space<vmem>>) attributes {dimension_semantics = [#tpu.dimension_semantics<parallel>], iteration_bounds = array<i64: 2>, scalar_prefetch = 0 : i64, scratch_operands = 0 : i64, tpu.core_type = #tpu.core_type<tc>, window_params = [{transform_indices = @transform_0, window_bounds = array<i64: 256, 64>}, {transform_indices = @transform_1, window_bounds = array<i64: 256, 1>}, {pipeline_mode = #tpu.pipeline_mode<synchronous>, transform_indices = @transform_2, window_bounds = array<i64: 64, 96>}, {pipeline_mode = #tpu.pipeline_mode<synchronous>, transform_indices = @transform_3, window_bounds = array<i64: 1, 96>}, {transform_indices = @transform_4, window_bounds = array<i64: 256, 96>}]} {
    %c0 = arith.constant 0 : index
    %c0_0 = arith.constant 0 : index
    %0 = vector.load %arg1[%c0, %c0_0] : memref<256x64xf32, #tpu.memory_space<vmem>>, vector<256x64xf32>
    %c0_1 = arith.constant 0 : index
    %c0_2 = arith.constant 0 : index
    %1 = vector.load %arg2[%c0_1, %c0_2] : memref<256x1xf32, #tpu.memory_space<vmem>>, vector<256x1xf32>
    %2 = vector.broadcast %1 : vector<256x1xf32> to vector<256x64xf32>
    %3 = arith.mulf %0, %2 : vector<256x64xf32>
    %c0_3 = arith.constant 0 : index
    %c0_4 = arith.constant 0 : index
    %4 = vector.load %arg3[%c0_3, %c0_4] : memref<64x96xf32, #tpu.memory_space<vmem>>, vector<64x96xf32>
    %cst = arith.constant dense<0.000000e+00> : vector<256x96xf32>
    %5 = tpu.matmul %3, %4, %cst {dimension_numbers = #tpu.dot_dimension_numbers<[1], [0], [0], [1], [0, 0, 1, 1], [], []>} : vector<256x64xf32>, vector<64x96xf32>, vector<256x96xf32> -> vector<256x96xf32>
    %c0_5 = arith.constant 0 : index
    %c0_6 = arith.constant 0 : index
    %6 = vector.load %arg4[%c0_5, %c0_6] : memref<1x96xf32, #tpu.memory_space<vmem>>, vector<1x96xf32>
    %7 = vector.broadcast %6 : vector<1x96xf32> to vector<256x96xf32>
    %8 = arith.addf %5, %7 : vector<256x96xf32>
    %cst_7 = arith.constant 0.000000e+00 : f32
    %9 = vector.broadcast %cst_7 : f32 to vector<256x96xf32>
    %10 = arith.maximumf %8, %9 : vector<256x96xf32>
    %c0_8 = arith.constant 0 : index
    %c0_9 = arith.constant 0 : index
    %11 = vector.load %arg5[%c0_8, %c0_9] : memref<256x96xf32, #tpu.memory_space<vmem>>, vector<256x96xf32>
    tpu.vector_store %arg5[%c0_8, %c0_9], %10 {strides = array<i32>} : memref<256x96xf32, #tpu.memory_space<vmem>>, vector<256x96xf32>,
    return
  }
  func.func @transform_0(%arg0: i32) -> (i32, i32) {
    %c0_i32 = arith.constant 0 : i32
    %c0_i32_0 = arith.constant 0 : i32
    return %arg0, %c0_i32 : i32, i32
  }
  func.func @transform_1(%arg0: i32) -> (i32, i32) {
    %c0_i32 = arith.constant 0 : i32
    %c0_i32_0 = arith.constant 0 : i32
    return %arg0, %c0_i32 : i32, i32
  }
  func.func @transform_2(%arg0: i32) -> (i32, i32) {
    %c0_i32 = arith.constant 0 : i32
    %c0_i32_0 = arith.constant 0 : i32
    %c0_i32_1 = arith.constant 0 : i32
    return %c0_i32, %c0_i32_0 : i32, i32
  }
  func.func @transform_3(%arg0: i32) -> (i32, i32) {
    %c0_i32 = arith.constant 0 : i32
    %c0_i32_0 = arith.constant 0 : i32
    %c0_i32_1 = arith.constant 0 : i32
    return %c0_i32, %c0_i32_0 : i32, i32
  }
  func.func @transform_4(%arg0: i32) -> (i32, i32) {
    %c0_i32 = arith.constant 0 : i32
    %c0_i32_0 = arith.constant 0 : i32
    return %arg0, %c0_i32 : i32, i32
  }
}

</mosaic_0001>

<bundles_post_ra>
// kernel: tpu_custom_call.1
= control target key start
LH: loop header
LB: loop body
LE: loop exit
PB: predicated region body
PF: predicated region fallthrough
CT: control target
= control target key end

     0   :  { %s1665_s15 = smov 0   ;;  %s1667_s16 = smov 0   ;;  %s2079_s0 = inlined_call_operand.vmem [shape: f32[300,64], index: 0, kind: input, shape index: {}]   ;;  %s2080_s1 = inlined_call_operand.vmem [shape: f32[300,1], index: 1, kind: input, shape index: {}]   ;;  %s2081_s2 = inlined_call_operand.vmem [shape: f32[64,96], index: 2, kind: input, shape index: {}]   ;;  %s2082_s3 = inlined_call_operand.vmem [shape: f32[1,96], index: 3, kind: input, shape index: {}]   ;;  %s2083_s4 = inlined_call_operand.vmem [shape: f32[300,96], index: 4, kind: output, shape index: {}]  }
   0x1   :  { %s1669_s17 = smov 0  }
   0x2 LB: > { %s1678_s18 = sadd.s32 4294967295, %s1605_s17   ;;  %s1680_s19 = sadd.s32 1, %s1605_s17   ;;  %s1605_s17 = sphi %s1669_s17, %s2092_s17   ;;  %s1601_s16 = sphi %s1667_s16, %s2091_s16   ;;  %s1597_s15 = sphi %s1665_s15, %s2090_s15  }
   0x3   : > { %s112_s20 = ssub.s32 %s1605_s17, %s1680_s19  ;;  %s115_s21 = sadd.s32 1, %s1601_s16 }
   0x4   : > { %p113_p0 = scmp.eq.s32.totalorder %s112_s20, 0  ;;  %p125_p1 = scmp.ne.s32.totalorder %s1601_s16, %s1597_s15 }
   0x5   : > { %p126_p2 = scmp.eq.s32.totalorder %s1678_s18, 1  ;;  %p1273_p3 = scmp.ge.s32.totalorder %s1605_s17, 1 }
   0x6   : > { %s1688_s22 = scalar_select %p113_p0, %s1601_s16, %s115_s21  }
   0x7   : > { %p1690_p4 = por %p126_p2, %p125_p1  ;;  %p190_p5 = scmp.lt.s32.totalorder %s1605_s17, 3 }
   0x9   : > { %p191_p6 = pnand %p1273_p3, %p190_p5 }
   0xa   : > { %s1695_s24 = sshll.u32 (!%p191_p6), %s1678_s18, 5  ;;  %v517_v0 = vld [vmem:[%s2081_s2] sm:$0xff] (!%p191_p6)  ;;  %v518_v1 = vld [vmem:[%s2081_s2 + $0x8] sm:$0xff] (!%p191_p6)  ;;  %v519_v2 = vld [vmem:[%s2081_s2 + $0x10] sm:$0xff] (!%p191_p6)  ;;  %v1639_v3 = vmov (!%p191_p6), 0   ;;  %vm532_vm0 = vcmask (!%p191_p6), 523264  }
   0xb   : > { %194 = sbr.rel (%p191_p6) target bundleno = 487 (0x1e7), region = 36  ;;  %1550 = vset.pattern.permute.xlu1 (!%p191_p6), %v1639_v3  ;;  %1549 = vset.pattern.permute.xlu0 (!%p191_p6), %v1639_v3  ;;  %p233_p7 = scmp.lt.s32.totalorder (!%p191_p6), %s1695_s24, 37  ;;  %v1436_v4 = vpack.c.bf16 (!%p191_p6), %v518_v1, %v517_v0  ;;  %v520_v5 = vld [vmem:[%s2081_s2 + $0x18] sm:$0xff] (!%p191_p6)  ;;  %v521_v7 = vld [vmem:[%s2081_s2 + $0x20] sm:$0xff] (!%p191_p6)  ;;  %v522_v8 = vld [vmem:[%s2081_s2 + $0x28] sm:$0xff] (!%p191_p6)  ;;  %vm886_vm1 = vcmask (!%p191_p6), 785408  }
   0xc   : > { %v1440_v6 = vpack.c.bf16 (!%p191_p6), %v520_v5, %v519_v2  ;;  %v1444_v9 = vpack.c.bf16 (!%p191_p6), %v522_v8, %v521_v7  ;;  %v523_v10 = vld [vmem:[%s2081_s2 + $0x30] sm:$0xff] (!%p191_p6)  ;;  %v524_v13 = vld [vmem:[%s2081_s2 + $0x38] sm:$0xff] (!%p191_p6)  ;;  %s225_s30 = sand.u32 (!%p191_p6), 1, %s1597_s15  }
   0xd   : > { %1437 = vmatprep.subr.bf16.mxu0 (!%p191_p6), %v1436_v4  ;;  %1452 = vmatprep.subr.bf16.mxu1 (!%p191_p6), %v1436_v4  ;;  %v1448_v16 = vpack.c.bf16 (!%p191_p6), %v524_v13, %v523_v10 }
   0xe   : > { %1439 = vmatpush3.bf16.msra.mxu0 (!%p191_p6), %v1436_v4  ;;  %1456 = vmatpush3.bf16.msra.mxu1 (!%p191_p6), %v1436_v4 }
   0xf   : > { %1441 = vmatprep.subr.bf16.mxu0 (!%p191_p6), %v1440_v6  ;;  %1453 = vmatprep.subr.bf16.mxu1 (!%p191_p6), %v1440_v6 }
  0x12   : > { %s1711_s7 = scalar_select %p233_p7, %s1695_s24, 37  ;;  %1443 = vmatpush3.bf16.msra.mxu0 %v1440_v6  ;;  %1457 = vmatpush3.bf16.msra.mxu1 %v1440_v6 }
  0x13   : > { %1445 = vmatprep.subr.bf16.mxu0 %v1444_v9  ;;  %1454 = vmatprep.subr.bf16.mxu1 %v1444_v9  ;;  %s927_s15 = ssub.s32 (%p1690_p4), 38, %s1695_s24  ;;  %s1329_s9 = sshll.u32 (%p1690_p4), %s1678_s18, 8 }
  0x14   : > { %s1276_s12 = sshll.u32 %s1711_s7, 3  ;;  %s1274_s7 = sshll.u32 %s225_s30, 8 }
  0x15   : > { %s1725_s17 = scalar_lea.vmem %s2080_s1, %s1276_s12  ;;  %s1770_s29 = scalar_lea.vmem %s2079_s0, %s1276_s12 }
  0x16   : > { %v294_v11 = vld [vmem:[%s1725_s17 + $0x8] sm:$0xff]  ;;  %v293_v12 = vld [vmem:[%s1725_s17] sm:$0xff]  ;;  %v311_v17 = vld [vmem:[%s1725_s17 + $0x90] sm:$0xff]  ;;  %1447 = vmatpush3.bf16.msra.mxu0 %v1444_v9  ;;  %1458 = vmatpush3.bf16.msra.mxu1 %v1444_v9  ;;  %s1844_s8 = scalar_lea.vmem [#allocation2], %s1274_s7   ;;  %p928_p8 = scmp.lt.s32.totalorder (%p1690_p4), %s927_s15, 32 }
  0x17   : > { %332 = vperm.xlu1 %1550, %v294_v11   ;;  %327 = vperm.xlu0 %1549, %v293_v12   ;;  %v310_v14 = vld [vmem:[%s1725_s17 + $0x88] sm:$0xff]  ;;  %v309_v15 = vld [vmem:[%s1725_s17 + $0x80] sm:$0xff]  ;;  %v295_v18 = vld [vmem:[%s1725_s17 + $0x10] sm:$0xff]  ;;  %s1947_s12 = scalar_lea.vmem (%p1690_p4), %s2083_s4, %s1329_s9  }
  0x18   : > { %1449 = vmatprep.subr.bf16.mxu0 %v1448_v16  ;;  %1455 = vmatprep.subr.bf16.mxu1 %v1448_v16  ;;  %v312_v19 = vld [vmem:[%s1725_s17 + $0x98] sm:$0xff]  ;;  %v313_v21 = vld [vmem:[%s1725_s17 + $0xa0] sm:$0xff]  ;;  %v314_v23 = vld [vmem:[%s1725_s17 + $0xa8] sm:$0xff] }
  0x19   : > { %v296_v20 = vld [vmem:[%s1725_s17 + $0x18] sm:$0xff]  ;;  %v297_v22 = vld [vmem:[%s1725_s17 + $0x20] sm:$0xff]  ;;  %v298_v24 = vld [vmem:[%s1725_s17 + $0x28] sm:$0xff] }
  0x1a   : > { %1451 = vmatpush3.bf16.msra.mxu0 %v1448_v16  ;;  %1459 = vmatpush3.bf16.msra.mxu1 %v1448_v16  ;;  %v315_v25 = vld [vmem:[%s1725_s17 + $0xb0] sm:$0xff]  ;;  %v316_v27 = vld [vmem:[%s1725_s17 + $0xb8] sm:$0xff]  ;;  %v317_v29 = vld [vmem:[%s1725_s17 + $0xc0] sm:$0xff] }
  0x1b   : > { %412 = vperm.xlu1 %1550, %v310_v14   ;;  %407 = vperm.xlu0 %1549, %v309_v15   ;;  %v299_v26 = vld [vmem:[%s1725_s17 + $0x30] sm:$0xff]  ;;  %v300_v28 = vld [vmem:[%s1725_s17 + $0x38] sm:$0xff]  ;;  %v301_v30 = vld [vmem:[%s1725_s17 + $0x40] sm:$0xff] }
  0x1c   : > { %v318_v31 = vld [vmem:[%s1725_s17 + $0xc8] sm:$0xff]  ;;  %v319_v33 = vld [vmem:[%s1725_s17 + $0xd0] sm:$0xff]  ;;  %v320_v35 = vld [vmem:[%s1725_s17 + $0xd8] sm:$0xff] }
  0x1d   : > { %v302_v32 = vld [vmem:[%s1725_s17 + $0x48] sm:$0xff]  ;;  %v303_v34 = vld [vmem:[%s1725_s17 + $0x50] sm:$0xff]  ;;  %v304_v36 = vld [vmem:[%s1725_s17 + $0x58] sm:$0xff] }
  0x1e   : > { %v321_v37 = vld [vmem:[%s1725_s17 + $0xe0] sm:$0xff]  ;;  %v322_v39 = vld [vmem:[%s1725_s17 + $0xe8] sm:$0xff]  ;;  %v323_v41 = vld [vmem:[%s1725_s17 + $0xf0] sm:$0xff] }
  0x1f   : > { %417 = vperm.xlu1 %1550, %v311_v17   ;;  %337 = vperm.xlu0 %1549, %v295_v18   ;;  %v305_v38 = vld [vmem:[%s1725_s17 + $0x60] sm:$0xff]  ;;  %v306_v40 = vld [vmem:[%s1725_s17 + $0x68] sm:$0xff]  ;;  %v307_v42 = vld [vmem:[%s1725_s17 + $0x70] sm:$0xff] }
  0x20   : > { %v324_v43 = vld [vmem:[%s1725_s17 + $0xf8] sm:$0xff]  ;;  %v262_v45 = vld [vmem:[%s1770_s29 + $0x8] sm:$0xff]  ;;  %v261_v46 = vld [vmem:[%s1770_s29] sm:$0xff] }
  0x21   : > { %v308_v44 = vld [vmem:[%s1725_s17 + $0x78] sm:$0xff]  ;;  %v278_v51 = vld [vmem:[%s1770_s29 + $0x88] sm:$0xff]  ;;  %v277_v52 = vld [vmem:[%s1770_s29 + $0x80] sm:$0xff] }
  0x22   : > { %v279_v57 = vld [vmem:[%s1770_s29 + $0x90] sm:$0xff]  ;;  %v280_v63 = vld [vmem:[%s1770_s29 + $0x98] sm:$0xff]  ;;  %v281_v5 = vld [vmem:[%s1770_s29 + $0xa0] sm:$0xff] }
  0x23   : > { %422 = vperm.xlu1 %1550, %v312_v19   ;;  %342 = vperm.xlu0 %1549, %v296_v20   ;;  %v263_v58 = vld [vmem:[%s1770_s29 + $0x10] sm:$0xff]  ;;  %v264_v0 = vld [vmem:[%s1770_s29 + $0x18] sm:$0xff]  ;;  %v265_v6 = vld [vmem:[%s1770_s29 + $0x20] sm:$0xff] }
  0x24   : > { %v282_v11 = vld [vmem:[%s1770_s29 + $0xa8] sm:$0xff]  ;;  %v283_v17 = vld [vmem:[%s1770_s29 + $0xb0] sm:$0xff] }
  0x25   : > { %v266_v12 = vld [vmem:[%s1770_s29 + $0x28] sm:$0xff]  ;;  %v267_v18 = vld [vmem:[%s1770_s29 + $0x30] sm:$0xff] }
  0x27   : > { %427 = vperm.xlu1 %1550, %v313_v21   ;;  %347 = vperm.xlu0 %1549, %v297_v22  }
  0x2b   : > { %432 = vperm.xlu1 %1550, %v314_v23   ;;  %352 = vperm.xlu0 %1549, %v298_v24   ;;  %v284_v23 = vld [vmem:[%s1770_s29 + $0xb8] sm:$0xff] }
  0x2c   : > { %v268_v24 = vld [vmem:[%s1770_s29 + $0x38] sm:$0xff] }
  0x2f   : > { %437 = vperm.xlu1 %1550, %v315_v25   ;;  %357 = vperm.xlu0 %1549, %v299_v26  }
  0x33   : > { %442 = vperm.xlu1 %1550, %v316_v27   ;;  %362 = vperm.xlu0 %1549, %v300_v28  }
  0x37   : > { %447 = vperm.xlu1 %1550, %v317_v29   ;;  %367 = vperm.xlu0 %1549, %v301_v30   ;;  %v285_v29 = vld [vmem:[%s1770_s29 + $0xc0] sm:$0xff] }
  0x38   : > { %v269_v30 = vld [vmem:[%s1770_s29 + $0x40] sm:$0xff] }
  0x3b   : > { %452 = vperm.xlu1 %1550, %v318_v31   ;;  %372 = vperm.xlu0 %1549, %v302_v32  }
  0x3f   : > { %457 = vperm.xlu1 %1550, %v319_v33   ;;  %377 = vperm.xlu0 %1549, %v303_v34  }
  0x43   : > { %462 = vperm.xlu1 %1550, %v320_v35   ;;  %382 = vperm.xlu0 %1549, %v304_v36   ;;  %v286_v35 = vld [vmem:[%s1770_s29 + $0xc8] sm:$0xff] }
  0x44   : > { %v270_v36 = vld [vmem:[%s1770_s29 + $0x48] sm:$0xff] }
  0x47   : > { %467 = vperm.xlu1 %1550, %v321_v37   ;;  %387 = vperm.xlu0 %1549, %v305_v38  }
  0x4b   : > { %472 = vperm.xlu1 %1550, %v322_v39   ;;  %392 = vperm.xlu0 %1549, %v306_v40  }
  0x4f   : > { %477 = vperm.xlu1 %1550, %v323_v41   ;;  %397 = vperm.xlu0 %1549, %v307_v42   ;;  %v287_v41 = vld [vmem:[%s1770_s29 + $0xd0] sm:$0xff] }
  0x50   : > { %v271_v42 = vld [vmem:[%s1770_s29 + $0x50] sm:$0xff] }
  0x53   : > { %482 = vperm.xlu1 %1550, %v324_v43   ;;  %402 = vperm.xlu0 %1549, %v308_v44  }
  0x96   : > { %v333_v47 = vpop.permute.xlu1 %332  ;;  %v328_v48 = vpop.permute.xlu0 %327 }
  0x97   : > { %v486_v49 = vmul.f32 %v333_v47, %v262_v45  ;;  %v485_v50 = vmul.f32 %v328_v48, %v261_v46  ;;  %v288_v47 = vld [vmem:[%s1770_s29 + $0xd8] sm:$0xff] }
  0x98   : > { %v272_v48 = vld [vmem:[%s1770_s29 + $0x58] sm:$0xff] }
  0x99   : > { %1388 = vmatprep.mubr.msk.f32.mxu0 %vm532_vm0, %v485_v50 }
  0x9a   : > { %v413_v53 = vpop.permute.xlu1 %412  ;;  %v408_v54 = vpop.permute.xlu0 %407  ;;  %1389 = vmatmul.mubr.msk.f32.vlgmr.msra.gmra.mrb[0].mxu0 %vm532_vm0, %v486_v49 }
  0x9b   : > { %v502_v55 = vmul.f32 %v413_v53, %v278_v51  ;;  %v501_v56 = vmul.f32 %v408_v54, %v277_v52  ;;  %v289_v53 = vld [vmem:[%s1770_s29 + $0xe0] sm:$0xff] }
  0x9c   : > { %v273_v54 = vld [vmem:[%s1770_s29 + $0x60] sm:$0xff] }
  0x9d   : > { %1412 = vmatprep.mubr.msk.f32.mxu1 %vm532_vm0, %v501_v56 }
  0x9e   : > { %v418_v59 = vpop.permute.xlu1 %417  ;;  %v338_v60 = vpop.permute.xlu0 %337  ;;  %1413 = vmatmul.mubr.msk.f32.vlgmr.msra.gmra.mrb[0].mxu1 %vm532_vm0, %v502_v55 }
  0x9f   : > { %v503_v61 = vmul.f32 %v418_v59, %v279_v57  ;;  %v487_v62 = vmul.f32 %v338_v60, %v263_v58  ;;  %v290_v59 = vld [vmem:[%s1770_s29 + $0xe8] sm:$0xff] }
  0xa0   : > { %v274_v60 = vld [vmem:[%s1770_s29 + $0x68] sm:$0xff] }
  0xa1   : > { %1391 = vmatprep.mubr.msk.f32.mxu0 %vm532_vm0, %v487_v62  ;;  %1415 = vmatprep.mubr.msk.f32.mxu1 %vm532_vm0, %v503_v61 }
  0xa2   : > { %v423_v1 = vpop.permute.xlu1 %422  ;;  %v343_v2 = vpop.permute.xlu0 %342 }
  0xa3   : > { %v504_v3 = vmul.f32 %v423_v1, %v280_v63  ;;  %v488_v4 = vmul.f32 %v343_v2, %v264_v0  ;;  %v291_v1 = vld [vmem:[%s1770_s29 + $0xf0] sm:$0xff] }
  0xa4   : > { %v275_v2 = vld [vmem:[%s1770_s29 + $0x70] sm:$0xff] }
  0xa5   : > { %1392 = vmatmul.mubr.msk.f32.gmra.mrb[2].mxu0 %vm532_vm0, %v488_v4  ;;  %1416 = vmatmul.mubr.msk.f32.gmra.mrb[2].mxu1 %vm532_vm0, %v504_v3 }
  0xa6   : > { %v428_v7 = vpop.permute.xlu1 %427  ;;  %v348_v8 = vpop.permute.xlu0 %347 }
  0xa7   : > { %v505_v9 = vmul.f32 %v428_v7, %v281_v5  ;;  %v489_v10 = vmul.f32 %v348_v8, %v265_v6  ;;  %v292_v7 = vld [vmem:[%s1770_s29 + $0xf8] sm:$0xff] }
  0xa8   : > { %v276_v8 = vld [vmem:[%s1770_s29 + $0x78] sm:$0xff] }
  0xa9   : > { %1394 = vmatprep.mubr.msk.f32.mxu0 %vm532_vm0, %v489_v10  ;;  %1418 = vmatprep.mubr.msk.f32.mxu1 %vm532_vm0, %v505_v9 }
  0xaa   : > { %v433_v13 = vpop.permute.xlu1 %432  ;;  %v353_v14 = vpop.permute.xlu0 %352 }
  0xab   : > { %v506_v15 = vmul.f32 %v433_v13, %v282_v11  ;;  %v490_v16 = vmul.f32 %v353_v14, %v266_v12  ;;  %v1840_v13 = vld [vmem:[%s2082_s3] ss:$0 sm:$0xff] }
  0xad   : > { %1395 = vmatmul.mubr.msk.f32.gmra.mrb[4].mxu0 %vm532_vm0, %v490_v16  ;;  %1419 = vmatmul.mubr.msk.f32.gmra.mrb[4].mxu1 %vm532_vm0, %v506_v15 }
  0xae   : > { %v438_v19 = vpop.permute.xlu1 %437  ;;  %v358_v20 = vpop.permute.xlu0 %357 }
  0xaf   : > { %v507_v21 = vmul.f32 %v438_v19, %v283_v17  ;;  %v491_v22 = vmul.f32 %v358_v20, %v267_v18 }
  0xb1   : > { %1397 = vmatprep.mubr.msk.f32.mxu0 %vm532_vm0, %v491_v22  ;;  %1421 = vmatprep.mubr.msk.f32.mxu1 %vm532_vm0, %v507_v21 }
  0xb2   : > { %v443_v25 = vpop.permute.xlu1 %442  ;;  %v363_v26 = vpop.permute.xlu0 %362 }
  0xb3   : > { %v508_v27 = vmul.f32 %v443_v25, %v284_v23  ;;  %v492_v28 = vmul.f32 %v363_v26, %v268_v24 }
  0xb5   : > { %1398 = vmatmul.mubr.msk.f32.gmra.mrb[6].mxu0 %vm532_vm0, %v492_v28  ;;  %1422 = vmatmul.mubr.msk.f32.gmra.mrb[6].mxu1 %vm532_vm0, %v508_v27 }
  0xb6   : > { %v448_v31 = vpop.permute.xlu1 %447  ;;  %v368_v32 = vpop.permute.xlu0 %367 }
  0xb7   : > { %v509_v33 = vmul.f32 %v448_v31, %v285_v29  ;;  %v493_v34 = vmul.f32 %v368_v32, %v269_v30 }
  0xb9   : > { %1400 = vmatprep.mubr.msk.f32.mxu0 %vm532_vm0, %v493_v34  ;;  %1424 = vmatprep.mubr.msk.f32.mxu1 %vm532_vm0, %v509_v33 }
  0xba   : > { %v453_v37 = vpop.permute.xlu1 %452  ;;  %v373_v38 = vpop.permute.xlu0 %372 }
  0xbb   : > { %v510_v39 = vmul.f32 %v453_v37, %v286_v35  ;;  %v494_v40 = vmul.f32 %v373_v38, %v270_v36 }
  0xbd   : > { %1401 = vmatmul.mubr.msk.f32.gmra.mrb[8].mxu0 %vm532_vm0, %v494_v40  ;;  %1425 = vmatmul.mubr.msk.f32.gmra.mrb[8].mxu1 %vm532_vm0, %v510_v39 }
  0xbe   : > { %v458_v43 = vpop.permute.xlu1 %457  ;;  %v378_v44 = vpop.permute.xlu0 %377 }
  0xbf   : > { %v511_v45 = vmul.f32 %v458_v43, %v287_v41  ;;  %v495_v46 = vmul.f32 %v378_v44, %v271_v42 }
  0xc1   : > { %1403 = vmatprep.mubr.msk.f32.mxu0 %vm532_vm0, %v495_v46  ;;  %1427 = vmatprep.mubr.msk.f32.mxu1 %vm532_vm0, %v511_v45 }
  0xc2   : > { %v463_v49 = vpop.permute.xlu1 %462  ;;  %v383_v50 = vpop.permute.xlu0 %382 }
  0xc3   : > { %v512_v51 = vmul.f32 %v463_v49, %v288_v47  ;;  %v496_v52 = vmul.f32 %v383_v50, %v272_v48 }
  0xc5   : > { %1404 = vmatmul.mubr.msk.f32.gmra.mrb[10].mxu0 %vm532_vm0, %v496_v52  ;;  %1428 = vmatmul.mubr.msk.f32.gmra.mrb[10].mxu1 %vm532_vm0, %v512_v51 }
  0xc6   : > { %v468_v55 = vpop.permute.xlu1 %467  ;;  %v388_v56 = vpop.permute.xlu0 %387 }
  0xc7   : > { %v513_v57 = vmul.f32 %v468_v55, %v289_v53  ;;  %v497_v58 = vmul.f32 %v388_v56, %v273_v54 }
  0xc9   : > { %1406 = vmatprep.mubr.msk.f32.mxu0 %vm532_vm0, %v497_v58  ;;  %1430 = vmatprep.mubr.msk.f32.mxu1 %vm532_vm0, %v513_v57 }
  0xca   : > { %v473_v61 = vpop.permute.xlu1 %472  ;;  %v393_v62 = vpop.permute.xlu0 %392 }
  0xcb   : > { %v514_v63 = vmul.f32 %v473_v61, %v290_v59  ;;  %v498_v0 = vmul.f32 %v393_v62, %v274_v60 }
  0xcd   : > { %1407 = vmatmul.mubr.msk.f32.gmra.mrb[12].mxu0 %vm532_vm0, %v498_v0  ;;  %1431 = vmatmul.mubr.msk.f32.gmra.mrb[12].mxu1 %vm532_vm0, %v514_v63 }
  0xce   : > { %v478_v3 = vpop.permute.xlu1 %477  ;;  %v398_v4 = vpop.permute.xlu0 %397 }
  0xcf   : > { %v515_v5 = vmul.f32 %v478_v3, %v291_v1  ;;  %v499_v6 = vmul.f32 %v398_v4, %v275_v2 }
  0xd1   : > { %1409 = vmatprep.mubr.msk.f32.mxu0 %vm532_vm0, %v499_v6  ;;  %1433 = vmatprep.mubr.msk.f32.mxu1 %vm532_vm0, %v515_v5 }
  0xd2   : > { %v483_v9 = vpop.permute.xlu1 %482  ;;  %v403_v10 = vpop.permute.xlu0 %402 }
  0xd3   : > { %v516_v11 = vmul.f32 %v483_v9, %v292_v7  ;;  %v500_v12 = vmul.f32 %v403_v10, %v276_v8 }
  0xd5   : > { %1410 = vmatmul.mubr.msk.f32.gmra.mrb[14].mxu0 %vm532_vm0, %v500_v12  ;;  %1434 = vmatmul.mubr.msk.f32.gmra.mrb[14].mxu1 %vm532_vm0, %v516_v11 }
 0x16d   : > { %v1390_v14 = vpop.f32.mrb[0].mxu0 }
 0x16e   : > { %v701_v15 = vadd.f32 %v1390_v14, %v1840_v13  ;;  %v695_v16 = vpop.f32.mrb[1].mxu0 }
 0x16f   : > { %v696_v17 = vadd.f32 %v1840_v13, %v695_v16 }
 0x170   : > { %v855_v18 = vmax.f32 %v701_v15, 0.0 }
 0x171   : > { %v854_v19 = vmax.f32 %v696_v17, 0.0  ;;  %v1414_v20 = vpop.f32.mrb[0].mxu1 }
 0x172   : > { %888 = vst.msk [vmem:[%s1844_s8 + $0x8] sm:$0xff] %vm886_vm1, %v855_v18  ;;  %v781_v21 = vadd.f32 %v1414_v20, %v1840_v13  ;;  %v775_v22 = vpop.f32.mrb[1].mxu1 }
 0x173   : > { %887 = vst.msk [vmem:[%s1844_s8] sm:$0xff] %vm886_vm1, %v854_v19  ;;  %v776_v23 = vadd.f32 %v1840_v13, %v775_v22 }
 0x174   : > { %v871_v24 = vmax.f32 %v781_v21, 0.0 }
 0x175   : > { %v870_v25 = vmax.f32 %v776_v23, 0.0 }
 0x176   : > { %904 = vst.msk [vmem:[%s1844_s8 + $0x88] sm:$0xff] %vm886_vm1, %v871_v24 }
 0x177   : > { %903 = vst.msk [vmem:[%s1844_s8 + $0x80] sm:$0xff] %vm886_vm1, %v870_v25 }
 0x178   : > { %v1393_v26 = vpop.f32.mrb[2].mxu0  ;;  %v1417_v27 = vpop.f32.mrb[2].mxu1 }
 0x179   : > { %v711_v28 = vadd.f32 %v1393_v26, %v1840_v13  ;;  %v791_v29 = vadd.f32 %v1417_v27, %v1840_v13  ;;  %v705_v30 = vpop.f32.mrb[3].mxu0  ;;  %v785_v31 = vpop.f32.mrb[3].mxu1 }
 0x17a   : > { %v706_v32 = vadd.f32 %v1840_v13, %v705_v30  ;;  %v786_v33 = vadd.f32 %v1840_v13, %v785_v31 }
 0x17b   : > { %v857_v34 = vmax.f32 %v711_v28, 0.0  ;;  %v873_v35 = vmax.f32 %v791_v29, 0.0 }
 0x17c   : > { %v856_v36 = vmax.f32 %v706_v32, 0.0  ;;  %v872_v37 = vmax.f32 %v786_v33, 0.0 }
 0x17d   : > { %890 = vst.msk [vmem:[%s1844_s8 + $0x18] sm:$0xff] %vm886_vm1, %v857_v34  ;;  %906 = vst.msk [vmem:[%s1844_s8 + $0x98] sm:$0xff] %vm886_vm1, %v873_v35 }
 0x17e   : > { %889 = vst.msk [vmem:[%s1844_s8 + $0x10] sm:$0xff] %vm886_vm1, %v856_v36  ;;  %905 = vst.msk [vmem:[%s1844_s8 + $0x90] sm:$0xff] %vm886_vm1, %v872_v37 }
 0x180   : > { %v1396_v38 = vpop.f32.mrb[4].mxu0  ;;  %v1420_v39 = vpop.f32.mrb[4].mxu1 }
 0x181   : > { %v721_v40 = vadd.f32 %v1396_v38, %v1840_v13  ;;  %v801_v41 = vadd.f32 %v1420_v39, %v1840_v13  ;;  %v715_v42 = vpop.f32.mrb[5].mxu0  ;;  %v795_v43 = vpop.f32.mrb[5].mxu1 }
 0x182   : > { %v716_v44 = vadd.f32 %v1840_v13, %v715_v42  ;;  %v796_v45 = vadd.f32 %v1840_v13, %v795_v43 }
 0x183   : > { %v859_v46 = vmax.f32 %v721_v40, 0.0  ;;  %v875_v47 = vmax.f32 %v801_v41, 0.0 }
 0x184   : > { %v858_v48 = vmax.f32 %v716_v44, 0.0  ;;  %v874_v49 = vmax.f32 %v796_v45, 0.0 }
 0x185   : > { %892 = vst.msk [vmem:[%s1844_s8 + $0x28] sm:$0xff] %vm886_vm1, %v859_v46  ;;  %908 = vst.msk [vmem:[%s1844_s8 + $0xa8] sm:$0xff] %vm886_vm1, %v875_v47 }
 0x186   : > { %891 = vst.msk [vmem:[%s1844_s8 + $0x20] sm:$0xff] %vm886_vm1, %v858_v48  ;;  %907 = vst.msk [vmem:[%s1844_s8 + $0xa0] sm:$0xff] %vm886_vm1, %v874_v49 }
 0x188   : > { %v1399_v50 = vpop.f32.mrb[6].mxu0  ;;  %v1423_v51 = vpop.f32.mrb[6].mxu1 }
 0x189   : > { %v731_v52 = vadd.f32 %v1399_v50, %v1840_v13  ;;  %v811_v53 = vadd.f32 %v1423_v51, %v1840_v13  ;;  %v725_v54 = vpop.f32.mrb[7].mxu0  ;;  %v805_v55 = vpop.f32.mrb[7].mxu1 }
 0x18a   : > { %v726_v56 = vadd.f32 %v1840_v13, %v725_v54  ;;  %v806_v57 = vadd.f32 %v1840_v13, %v805_v55 }
 0x18b   : > { %v861_v58 = vmax.f32 %v731_v52, 0.0  ;;  %v877_v59 = vmax.f32 %v811_v53, 0.0 }
 0x18c   : > { %v860_v60 = vmax.f32 %v726_v56, 0.0  ;;  %v876_v61 = vmax.f32 %v806_v57, 0.0 }
 0x18d   : > { %894 = vst.msk [vmem:[%s1844_s8 + $0x38] sm:$0xff] %vm886_vm1, %v861_v58  ;;  %910 = vst.msk [vmem:[%s1844_s8 + $0xb8] sm:$0xff] %vm886_vm1, %v877_v59 }
 0x18e   : > { %893 = vst.msk [vmem:[%s1844_s8 + $0x30] sm:$0xff] %vm886_vm1, %v860_v60  ;;  %909 = vst.msk [vmem:[%s1844_s8 + $0xb0] sm:$0xff] %vm886_vm1, %v876_v61 }
 0x190   : > { %v1402_v62 = vpop.f32.mrb[8].mxu0  ;;  %v1426_v63 = vpop.f32.mrb[8].mxu1 }
 0x191   : > { %v741_v0 = vadd.f32 %v1402_v62, %v1840_v13  ;;  %v821_v1 = vadd.f32 %v1426_v63, %v1840_v13  ;;  %v735_v2 = vpop.f32.mrb[9].mxu0  ;;  %v815_v3 = vpop.f32.mrb[9].mxu1 }
 0x192   : > { %v736_v4 = vadd.f32 %v1840_v13, %v735_v2  ;;  %v816_v5 = vadd.f32 %v1840_v13, %v815_v3 }
 0x193   : > { %v863_v6 = vmax.f32 %v741_v0, 0.0  ;;  %v879_v7 = vmax.f32 %v821_v1, 0.0 }
 0x194   : > { %v862_v8 = vmax.f32 %v736_v4, 0.0  ;;  %v878_v9 = vmax.f32 %v816_v5, 0.0 }
 0x195   : > { %896 = vst.msk [vmem:[%s1844_s8 + $0x48] sm:$0xff] %vm886_vm1, %v863_v6  ;;  %912 = vst.msk [vmem:[%s1844_s8 + $0xc8] sm:$0xff] %vm886_vm1, %v879_v7 }
 0x196   : > { %895 = vst.msk [vmem:[%s1844_s8 + $0x40] sm:$0xff] %vm886_vm1, %v862_v8  ;;  %911 = vst.msk [vmem:[%s1844_s8 + $0xc0] sm:$0xff] %vm886_vm1, %v878_v9 }
 0x198   : > { %v1405_v10 = vpop.f32.mrb[10].mxu0  ;;  %v1429_v11 = vpop.f32.mrb[10].mxu1 }
 0x199   : > { %v751_v12 = vadd.f32 %v1405_v10, %v1840_v13  ;;  %v831_v14 = vadd.f32 %v1429_v11, %v1840_v13  ;;  %v745_v15 = vpop.f32.mrb[11].mxu0  ;;  %v825_v16 = vpop.f32.mrb[11].mxu1 }
 0x19a   : > { %v746_v17 = vadd.f32 %v1840_v13, %v745_v15  ;;  %v826_v18 = vadd.f32 %v1840_v13, %v825_v16 }
 0x19b   : > { %v865_v19 = vmax.f32 %v751_v12, 0.0  ;;  %v881_v20 = vmax.f32 %v831_v14, 0.0 }
 0x19c   : > { %v864_v21 = vmax.f32 %v746_v17, 0.0  ;;  %v880_v22 = vmax.f32 %v826_v18, 0.0 }
 0x19d   : > { %898 = vst.msk [vmem:[%s1844_s8 + $0x58] sm:$0xff] %vm886_vm1, %v865_v19  ;;  %914 = vst.msk [vmem:[%s1844_s8 + $0xd8] sm:$0xff] %vm886_vm1, %v881_v20 }
 0x19e   : > { %897 = vst.msk [vmem:[%s1844_s8 + $0x50] sm:$0xff] %vm886_vm1, %v864_v21  ;;  %913 = vst.msk [vmem:[%s1844_s8 + $0xd0] sm:$0xff] %vm886_vm1, %v880_v22 }
 0x1a0   : > { %v1408_v23 = vpop.f32.mrb[12].mxu0  ;;  %v1432_v24 = vpop.f32.mrb[12].mxu1 }
 0x1a1   : > { %v761_v25 = vadd.f32 %v1408_v23, %v1840_v13  ;;  %v841_v26 = vadd.f32 %v1432_v24, %v1840_v13  ;;  %v755_v27 = vpop.f32.mrb[13].mxu0  ;;  %v835_v28 = vpop.f32.mrb[13].mxu1 }
 0x1a2   : > { %v756_v29 = vadd.f32 %v1840_v13, %v755_v27  ;;  %v836_v30 = vadd.f32 %v1840_v13, %v835_v28 }
 0x1a3   : > { %v867_v31 = vmax.f32 %v761_v25, 0.0  ;;  %v883_v32 = vmax.f32 %v841_v26, 0.0 }
 0x1a4   : > { %v866_v33 = vmax.f32 %v756_v29, 0.0  ;;  %v882_v34 = vmax.f32 %v836_v30, 0.0 }
 0x1a5   : > { %900 = vst.msk [vmem:[%s1844_s8 + $0x68] sm:$0xff] %vm886_vm1, %v867_v31  ;;  %916 = vst.msk [vmem:[%s1844_s8 + $0xe8] sm:$0xff] %vm886_vm1, %v883_v32 }
 0x1a6   : > { %899 = vst.msk [vmem:[%s1844_s8 + $0x60] sm:$0xff] %vm886_vm1, %v866_v33  ;;  %915 = vst.msk [vmem:[%s1844_s8 + $0xe0] sm:$0xff] %vm886_vm1, %v882_v34 }
 0x1a8   : > { %v1411_v35 = vpop.f32.mrb[14].mxu0  ;;  %v1435_v36 = vpop.f32.mrb[14].mxu1  ;;  %925 = sbr.rel (!%p1690_p4) target bundleno = 487 (0x1e7), region = 40 }
 0x1a9   : > { %v771_v37 = vadd.f32 %v1411_v35, %v1840_v13  ;;  %v851_v38 = vadd.f32 %v1435_v36, %v1840_v13  ;;  %v765_v39 = vpop.f32.mrb[15].mxu0  ;;  %v845_v40 = vpop.f32.mrb[15].mxu1 }
 0x1aa   : > { %v766_v41 = vadd.f32 %v1840_v13, %v765_v39  ;;  %v846_v42 = vadd.f32 %v1840_v13, %v845_v40 }
 0x1ab   : > { %v869_v43 = vmax.f32 %v771_v37, 0.0  ;;  %v885_v44 = vmax.f32 %v851_v38, 0.0 }
 0x1ac   : > { %v868_v45 = vmax.f32 %v766_v41, 0.0  ;;  %v884_v46 = vmax.f32 %v846_v42, 0.0 }
 0x1ad   : > { %902 = vst.msk [vmem:[%s1844_s8 + $0x78] sm:$0xff] %vm886_vm1, %v869_v43  ;;  %918 = vst.msk [vmem:[%s1844_s8 + $0xf8] sm:$0xff] %vm886_vm1, %v885_v44 }
 0x1ae   : > { %901 = vst.msk [vmem:[%s1844_s8 + $0x70] sm:$0xff] %vm886_vm1, %v868_v45  ;;  %917 = vst.msk [vmem:[%s1844_s8 + $0xf0] sm:$0xff] %vm886_vm1, %v884_v46 }
 0x1af   : > { %s2094_s15 = smov (!%p928_p8, %s927_s15), 32 }
 0x1b0   : > { %s1314_s13 = sshll.u32 %s2094_s15, 7 }
 0x1b1   : > { %p1317_p9 = scmp.eq.s32.totalorder %s1314_s13, 0 }
 0x1b2   : > { %s1953_s14 = sshrl.u32 (!%p1317_p9), %s2094_s15, 5 }
 0x1b3   : > { %936 = sbr.rel (%p1317_p9) target bundleno = 487 (0x1e7), region = 44  ;;  %p1318_p10 = scmp.le.s32.totalorder (!%p1317_p9), %s1953_s14, 0 }
 0x1ba   : > { %1220 = sbr.rel (%p1318_p10) target bundleno = 466 (0x1d2), region = 123  ;;  %s2085_s18 = smov (!%p1318_p10), %s1947_s12 }
 0x1bb   : > { %s2086_s23 = smov (!%p1318_p10), %s1844_s8  ;;  %s1962_s24 = smov (!%p1318_p10), 0  }
 0x1bc   : > { %s1964_s17 = smov (!%p1318_p10), 0  }
 0x1c1 LB: >> { %v1060_v13 = vld [vmem:[%s1613_s23] sm:$0xff]  ;;  %v1062_v47 = vld [vmem:[%s1613_s23 + $0x8] sm:$0xff]  ;;  %v1064_v48 = vld [vmem:[%s1613_s23 + $0x10] sm:$0xff]  ;;  %s1124_s20 = sadd.s32 1, %s1617_s24  ;;  %s1054_s17 = sadd.s32 1, %s1621_s17   ;;  %s1621_s17 = sphi %s1964_s17, %s1054_s17   ;;  %s1617_s24 = sphi %s1962_s24, %s2089_s24   ;;  %s1613_s23 = sphi %s2086_s23, %s2088_s23   ;;  %s1609_s18 = sphi %s2085_s18, %s2087_s18  }
 0x1c2   : >> { %1061 = vst [vmem:[%s1609_s18] sm:$0xff] %v1060_v13  ;;  %1063 = vst [vmem:[%s1609_s18 + $0x8] sm:$0xff] %v1062_v47  ;;  %v1066_v49 = vld [vmem:[%s1613_s23 + $0x18] sm:$0xff]  ;;  %v1068_v50 = vld [vmem:[%s1613_s23 + $0x20] sm:$0xff]  ;;  %p1125_p11 = scmp.ge.s32.totalorder %s1124_s20, %s1953_s14  ;;  %p1053_p12 = scmp.ge.s32.totalorder %s1054_s17, %s1953_s14 }
 0x1c3   : >> { %1065 = vst [vmem:[%s1609_s18 + $0x10] sm:$0xff] %v1064_v48  ;;  %v1070_v51 = vld [vmem:[%s1613_s23 + $0x28] sm:$0xff]  ;;  %1067 = vst [vmem:[%s1609_s18 + $0x18] sm:$0xff] %v1066_v49  ;;  %v1072_v52 = vld [vmem:[%s1613_s23 + $0x30] sm:$0xff] }
 0x1c4   : >> { %1069 = vst [vmem:[%s1609_s18 + $0x20] sm:$0xff] %v1068_v50  ;;  %1071 = vst [vmem:[%s1609_s18 + $0x28] sm:$0xff] %v1070_v51  ;;  %v1074_v53 = vld [vmem:[%s1613_s23 + $0x38] sm:$0xff]  ;;  %v1076_v54 = vld [vmem:[%s1613_s23 + $0x40] sm:$0xff]  ;;  %s2096_s20 = smov (%p1125_p11, %s1124_s20), 0 }
 0x1c5   : >> { %1073 = vst [vmem:[%s1609_s18 + $0x30] sm:$0xff] %v1072_v52  ;;  %1075 = vst [vmem:[%s1609_s18 + $0x38] sm:$0xff] %v1074_v53  ;;  %v1078_v55 = vld [vmem:[%s1613_s23 + $0x48] sm:$0xff]  ;;  %v1080_v56 = vld [vmem:[%s1613_s23 + $0x50] sm:$0xff]  ;;  %s1319_s21 = sshll.u32 %s2096_s20, 8  ;;  %s2089_s24 = smov %s2096_s20 }
 0x1c6   : >> { %1077 = vst [vmem:[%s1609_s18 + $0x40] sm:$0xff] %v1076_v54  ;;  %v1082_v57 = vld [vmem:[%s1613_s23 + $0x58] sm:$0xff]  ;;  %1079 = vst [vmem:[%s1609_s18 + $0x48] sm:$0xff] %v1078_v55  ;;  %v1084_v58 = vld [vmem:[%s1613_s23 + $0x60] sm:$0xff]  ;;  %s2020_s25 = scalar_lea.vmem %s1844_s8, %s1319_s21 [#allocation2]   ;;  %s1130_s26 = scalar_lea.vmem %s1947_s12, %s1319_s21  }
 0x1c7   : >> { %1081 = vst [vmem:[%s1609_s18 + $0x50] sm:$0xff] %v1080_v56  ;;  %1083 = vst [vmem:[%s1609_s18 + $0x58] sm:$0xff] %v1082_v57  ;;  %v1086_v59 = vld [vmem:[%s1613_s23 + $0x68] sm:$0xff]  ;;  %v1088_v60 = vld [vmem:[%s1613_s23 + $0x70] sm:$0xff] }
 0x1c8   : >> { %1085 = vst [vmem:[%s1609_s18 + $0x60] sm:$0xff] %v1084_v58  ;;  %1087 = vst [vmem:[%s1609_s18 + $0x68] sm:$0xff] %v1086_v59  ;;  %v1090_v61 = vld [vmem:[%s1613_s23 + $0x78] sm:$0xff]  ;;  %v1092_v62 = vld [vmem:[%s1613_s23 + $0x80] sm:$0xff] }
 0x1c9   : >> { %1089 = vst [vmem:[%s1609_s18 + $0x70] sm:$0xff] %v1088_v60  ;;  %v1094_v63 = vld [vmem:[%s1613_s23 + $0x88] sm:$0xff]  ;;  %1091 = vst [vmem:[%s1609_s18 + $0x78] sm:$0xff] %v1090_v61  ;;  %v1096_v0 = vld [vmem:[%s1613_s23 + $0x90] sm:$0xff] }
 0x1ca   : >> { %1093 = vst [vmem:[%s1609_s18 + $0x80] sm:$0xff] %v1092_v62  ;;  %1095 = vst [vmem:[%s1609_s18 + $0x88] sm:$0xff] %v1094_v63  ;;  %v1098_v1 = vld [vmem:[%s1613_s23 + $0x98] sm:$0xff]  ;;  %v1100_v2 = vld [vmem:[%s1613_s23 + $0xa0] sm:$0xff] }
 0x1cb   : >> { %1097 = vst [vmem:[%s1609_s18 + $0x90] sm:$0xff] %v1096_v0  ;;  %1099 = vst [vmem:[%s1609_s18 + $0x98] sm:$0xff] %v1098_v1  ;;  %v1102_v3 = vld [vmem:[%s1613_s23 + $0xa8] sm:$0xff]  ;;  %v1104_v4 = vld [vmem:[%s1613_s23 + $0xb0] sm:$0xff]  ;;  %1056 = sbr.rel (!%p1053_p12) target bundleno = 449 (0x1c1), region = 129 }
 0x1cc   : >> { %1101 = vst [vmem:[%s1609_s18 + $0xa0] sm:$0xff] %v1100_v2  ;;  %v1106_v5 = vld [vmem:[%s1613_s23 + $0xb8] sm:$0xff]  ;;  %1103 = vst [vmem:[%s1609_s18 + $0xa8] sm:$0xff] %v1102_v3  ;;  %v1108_v6 = vld [vmem:[%s1613_s23 + $0xc0] sm:$0xff] }
 0x1cd   : >> { %1105 = vst [vmem:[%s1609_s18 + $0xb0] sm:$0xff] %v1104_v4  ;;  %1107 = vst [vmem:[%s1609_s18 + $0xb8] sm:$0xff] %v1106_v5  ;;  %v1110_v7 = vld [vmem:[%s1613_s23 + $0xc8] sm:$0xff]  ;;  %v1112_v8 = vld [vmem:[%s1613_s23 + $0xd0] sm:$0xff] }
 0x1ce   : >> { %1109 = vst [vmem:[%s1609_s18 + $0xc0] sm:$0xff] %v1108_v6  ;;  %1111 = vst [vmem:[%s1609_s18 + $0xc8] sm:$0xff] %v1110_v7  ;;  %v1114_v9 = vld [vmem:[%s1613_s23 + $0xd8] sm:$0xff]  ;;  %v1116_v10 = vld [vmem:[%s1613_s23 + $0xe0] sm:$0xff] }
 0x1cf   : >> { %1113 = vst [vmem:[%s1609_s18 + $0xd0] sm:$0xff] %v1112_v8  ;;  %v1118_v11 = vld [vmem:[%s1613_s23 + $0xe8] sm:$0xff]  ;;  %1115 = vst [vmem:[%s1609_s18 + $0xd8] sm:$0xff] %v1114_v9  ;;  %v1120_v12 = vld [vmem:[%s1613_s23 + $0xf0] sm:$0xff] }
 0x1d0   : >> { %1117 = vst [vmem:[%s1609_s18 + $0xe0] sm:$0xff] %v1116_v10  ;;  %1119 = vst [vmem:[%s1609_s18 + $0xe8] sm:$0xff] %v1118_v11  ;;  %v1122_v14 = vld [vmem:[%s1613_s23 + $0xf8] sm:$0xff]  ;;  %s2088_s23 = smov %s2020_s25 }
 0x1d1   : >> { %1121 = vst [vmem:[%s1609_s18 + $0xf0] sm:$0xff] %v1120_v12  ;;  %1123 = vst [vmem:[%s1609_s18 + $0xf8] sm:$0xff] %v1122_v14  ;;  %s2087_s18 = smov %s1130_s26 }
 0x1d2 PF: > { %s2061_s27 = sand.u32 31, %s2094_s15   ;;  %s1330_s28 = sshll.u32 %s1953_s14, 8 }
 0x1d3   : > { %s1135_s29 = scalar_lea.vmem %s1844_s8, %s1330_s28 [#allocation2]   ;;  %s1137_s30 = scalar_lea.vmem %s1947_s12, %s1330_s28  }
 0x1d4   : > { %p1324_p13 = scmp.le.s32.totalorder %s2061_s27, 0 }
 0x1d5   : > { %s1623_s5 = smov (!%p1324_p13), %s1137_s30   ;;  %s1627_s6 = smov (!%p1324_p13), %s1135_s29  }
 0x1d6   : > { %1234 = sbr.rel (%p1324_p13) target bundleno = 487 (0x1e7), region = 134  ;;  %s1631_s7 = smov (!%p1324_p13), 0  }
 0x1d7   : > { %s1635_s9 = smov (!%p1324_p13), 0  }
 0x1dd LB: >> { %v1147_v15 = vld [vmem:[%s1629_s6] sm:$0xff]  ;;  %s1149_s15 = sadd.s32 1, %s1633_s7  ;;  %s1141_s9 = sadd.s32 1, %s1637_s9   ;;  %s1637_s9 = sphi %s1635_s9, %s1141_s9   ;;  %s1633_s7 = sphi %s1631_s7, %s1632_s7   ;;  %s1629_s6 = sphi %s1627_s6, %s1154_s6   ;;  %s1625_s5 = sphi %s1623_s5, %s1155_s5  }
 0x1de   : >> { %1148 = vst [vmem:[%s1625_s5] sm:$0xff] %v1147_v15  ;;  %p1150_p0 = scmp.ge.s32.totalorder %s1149_s15, %s2061_s27  ;;  %p1140_p1 = scmp.ge.s32.totalorder %s1141_s9, %s2061_s27 }
 0x1e0   : >> { %s2098_s15 = smov (%p1150_p0, %s1149_s15), 0  ;;  %1143 = sbr.rel (!%p1140_p1) target bundleno = 477 (0x1dd), region = 140 }
 0x1e1   : >> { %s1325_s8 = sshll.u32 %s2098_s15, 3  ;;  %s1632_s7 = smov %s2098_s15  }
 0x1e2   : >> { %s1154_s6 = scalar_lea.vmem %s1135_s29, %s1325_s8 [#allocation2]   ;;  %s1155_s5 = scalar_lea.vmem %s1137_s30, %s1325_s8  }
 0x1e7 PF: > { %p11_p2 = scmp.ge.s32.totalorder %s1680_s19, 4   ;;  %s2090_s15 = smov %s1601_s16 }
 0x1e8   : > { %s2091_s16 = smov %s1688_s22  ;;  %s2092_s17 = smov %s1680_s19 }
 0x1e9   :  { %13 = sbr.rel (!%p11_p2) target bundleno = 2 (0x2), region = 151 }

// kernel: tpu_custom_call.1
= control target key start
LH: loop header
LB: loop body
LE: loop exit
PB: predicated region body
PF: predicated region fallthrough
CT: control target
= control target key end

     0   :  { %s1665_s15 = smov 0   ;;  %s1667_s16 = smov 0   ;;  %s2079_s0 = inlined_call_operand.vmem [shape: f32[300,64], index: 0, kind: input, shape index: {}]   ;;  %s2080_s1 = inlined_call_operand.vmem [shape: f32[300,1], index: 1, kind: input, shape index: {}]   ;;  %s2081_s2 = inlined_call_operand.vmem [shape: f32[64,96], index: 2, kind: input, shape index: {}]   ;;  %s2082_s3 = inlined_call_operand.vmem [shape: f32[1,96], index: 3, kind: input, shape index: {}]   ;;  %s2083_s4 = inlined_call_operand.vmem [shape: f32[300,96], index: 4, kind: output, shape index: {}]  }
   0x1   :  { %s1669_s17 = smov 0  }
   0x2 LB: > { %s1678_s18 = sadd.s32 4294967295, %s1605_s17   ;;  %s1680_s19 = sadd.s32 1, %s1605_s17   ;;  %s1605_s17 = sphi %s1669_s17, %s2092_s17   ;;  %s1601_s16 = sphi %s1667_s16, %s2091_s16   ;;  %s1597_s15 = sphi %s1665_s15, %s2090_s15  }
   0x3   : > { %s112_s20 = ssub.s32 %s1605_s17, %s1680_s19  ;;  %s115_s21 = sadd.s32 1, %s1601_s16 }
   0x4   : > { %p113_p0 = scmp.eq.s32.totalorder %s112_s20, 0  ;;  %p125_p1 = scmp.ne.s32.totalorder %s1601_s16, %s1597_s15 }
   0x5   : > { %p126_p2 = scmp.eq.s32.totalorder %s1678_s18, 1  ;;  %p1273_p3 = scmp.ge.s32.totalorder %s1605_s17, 1 }
   0x6   : > { %s1688_s22 = scalar_select %p113_p0, %s1601_s16, %s115_s21  }
   0x7   : > { %p1690_p4 = por %p126_p2, %p125_p1  ;;  %p190_p5 = scmp.lt.s32.totalorder %s1605_s17, 3 }
   0x9   : > { %p191_p6 = pnand %p1273_p3, %p190_p5 }
   0xa   : > { %s1695_s24 = sshll.u32 (!%p191_p6), %s1678_s18, 5  ;;  %v517_v0 = vld [vmem:[%s2081_s2] sm:$0xff] (!%p191_p6)  ;;  %v518_v1 = vld [vmem:[%s2081_s2 + $0x8] sm:$0xff] (!%p191_p6)  ;;  %v519_v2 = vld [vmem:[%s2081_s2 + $0x10] sm:$0xff] (!%p191_p6)  ;;  %v1639_v3 = vmov (!%p191_p6), 0   ;;  %vm532_vm0 = vcmask (!%p191_p6), 523264  }
   0xb   : > { %194 = sbr.rel (%p191_p6) target bundleno = 487 (0x1e7), region = 36  ;;  %1550 = vset.pattern.permute.xlu1 (!%p191_p6), %v1639_v3  ;;  %1549 = vset.pattern.permute.xlu0 (!%p191_p6), %v1639_v3  ;;  %p233_p7 = scmp.lt.s32.totalorder (!%p191_p6), %s1695_s24, 37  ;;  %v1436_v4 = vpack.c.bf16 (!%p191_p6), %v518_v1, %v517_v0  ;;  %v520_v5 = vld [vmem:[%s2081_s2 + $0x18] sm:$0xff] (!%p191_p6)  ;;  %v521_v7 = vld [vmem:[%s2081_s2 + $0x20] sm:$0xff] (!%p191_p6)  ;;  %v522_v8 = vld [vmem:[%s2081_s2 + $0x28] sm:$0xff] (!%p191_p6)  ;;  %vm886_vm1 = vcmask (!%p191_p6), 785408  }
   0xc   : > { %v1440_v6 = vpack.c.bf16 (!%p191_p6), %v520_v5, %v519_v2  ;;  %v1444_v9 = vpack.c.bf16 (!%p191_p6), %v522_v8, %v521_v7  ;;  %v523_v10 = vld [vmem:[%s2081_s2 + $0x30] sm:$0xff] (!%p191_p6)  ;;  %v524_v13 = vld [vmem:[%s2081_s2 + $0x38] sm:$0xff] (!%p191_p6)  ;;  %s225_s30 = sand.u32 (!%p191_p6), 1, %s1597_s15  }
   0xd   : > { %1437 = vmatprep.subr.bf16.mxu0 (!%p191_p6), %v1436_v4  ;;  %1452 = vmatprep.subr.bf16.mxu1 (!%p191_p6), %v1436_v4  ;;  %v1448_v16 = vpack.c.bf16 (!%p191_p6), %v524_v13, %v523_v10 }
   0xe   : > { %1439 = vmatpush3.bf16.msra.mxu0 (!%p191_p6), %v1436_v4  ;;  %1456 = vmatpush3.bf16.msra.mxu1 (!%p191_p6), %v1436_v4 }
   0xf   : > { %1441 = vmatprep.subr.bf16.mxu0 (!%p191_p6), %v1440_v6  ;;  %1453 = vmatprep.subr.bf16.mxu1 (!%p191_p6), %v1440_v6 }
  0x12   : > { %s1711_s7 = scalar_select %p233_p7, %s1695_s24, 37  ;;  %1443 = vmatpush3.bf16.msra.mxu0 %v1440_v6  ;;  %1457 = vmatpush3.bf16.msra.mxu1 %v1440_v6 }
  0x13   : > { %1445 = vmatprep.subr.bf16.mxu0 %v1444_v9  ;;  %1454 = vmatprep.subr.bf16.mxu1 %v1444_v9  ;;  %s927_s15 = ssub.s32 (%p1690_p4), 38, %s1695_s24  ;;  %s1329_s9 = sshll.u32 (%p1690_p4), %s1678_s18, 8 }
  0x14   : > { %s1276_s12 = sshll.u32 %s1711_s7, 3  ;;  %s1274_s7 = sshll.u32 %s225_s30, 8 }
  0x15   : > { %s1725_s17 = scalar_lea.vmem %s2080_s1, %s1276_s12  ;;  %s1770_s29 = scalar_lea.vmem %s2079_s0, %s1276_s12 }
  0x16   : > { %v294_v11 = vld [vmem:[%s1725_s17 + $0x8] sm:$0xff]  ;;  %v293_v12 = vld [vmem:[%s1725_s17] sm:$0xff]  ;;  %v311_v17 = vld [vmem:[%s1725_s17 + $0x90] sm:$0xff]  ;;  %1447 = vmatpush3.bf16.msra.mxu0 %v1444_v9  ;;  %1458 = vmatpush3.bf16.msra.mxu1 %v1444_v9  ;;  %s1844_s8 = scalar_lea.vmem [#allocation2], %s1274_s7   ;;  %p928_p8 = scmp.lt.s32.totalorder (%p1690_p4), %s927_s15, 32 }
  0x17   : > { %332 = vperm.xlu1 %1550, %v294_v11   ;;  %327 = vperm.xlu0 %1549, %v293_v12   ;;  %v310_v14 = vld [vmem:[%s1725_s17 + $0x88] sm:$0xff]  ;;  %v309_v15 = vld [vmem:[%s1725_s17 + $0x80] sm:$0xff]  ;;  %v295_v18 = vld [vmem:[%s1725_s17 + $0x10] sm:$0xff]  ;;  %s1947_s12 = scalar_lea.vmem (%p1690_p4), %s2083_s4, %s1329_s9  }
  0x18   : > { %1449 = vmatprep.subr.bf16.mxu0 %v1448_v16  ;;  %1455 = vmatprep.subr.bf16.mxu1 %v1448_v16  ;;  %v312_v19 = vld [vmem:[%s1725_s17 + $0x98] sm:$0xff]  ;;  %v313_v21 = vld [vmem:[%s1725_s17 + $0xa0] sm:$0xff]  ;;  %v314_v23 = vld [vmem:[%s1725_s17 + $0xa8] sm:$0xff] }
  0x19   : > { %v296_v20 = vld [vmem:[%s1725_s17 + $0x18] sm:$0xff]  ;;  %v297_v22 = vld [vmem:[%s1725_s17 + $0x20] sm:$0xff]  ;;  %v298_v24 = vld [vmem:[%s1725_s17 + $0x28] sm:$0xff] }
  0x1a   : > { %1451 = vmatpush3.bf16.msra.mxu0 %v1448_v16  ;;  %1459 = vmatpush3.bf16.msra.mxu1 %v1448_v16  ;;  %v315_v25 = vld [vmem:[%s1725_s17 + $0xb0] sm:$0xff]  ;;  %v316_v27 = vld [vmem:[%s1725_s17 + $0xb8] sm:$0xff]  ;;  %v317_v29 = vld [vmem:[%s1725_s17 + $0xc0] sm:$0xff] }
  0x1b   : > { %412 = vperm.xlu1 %1550, %v310_v14   ;;  %407 = vperm.xlu0 %1549, %v309_v15   ;;  %v299_v26 = vld [vmem:[%s1725_s17 + $0x30] sm:$0xff]  ;;  %v300_v28 = vld [vmem:[%s1725_s17 + $0x38] sm:$0xff]  ;;  %v301_v30 = vld [vmem:[%s1725_s17 + $0x40] sm:$0xff] }
  0x1c   : > { %v318_v31 = vld [vmem:[%s1725_s17 + $0xc8] sm:$0xff]  ;;  %v319_v33 = vld [vmem:[%s1725_s17 + $0xd0] sm:$0xff]  ;;  %v320_v35 = vld [vmem:[%s1725_s17 + $0xd8] sm:$0xff] }
  0x1d   : > { %v302_v32 = vld [vmem:[%s1725_s17 + $0x48] sm:$0xff]  ;;  %v303_v34 = vld [vmem:[%s1725_s17 + $0x50] sm:$0xff]  ;;  %v304_v36 = vld [vmem:[%s1725_s17 + $0x58] sm:$0xff] }
  0x1e   : > { %v321_v37 = vld [vmem:[%s1725_s17 + $0xe0] sm:$0xff]  ;;  %v322_v39 = vld [vmem:[%s1725_s17 + $0xe8] sm:$0xff]  ;;  %v323_v41 = vld [vmem:[%s1725_s17 + $0xf0] sm:$0xff] }
  0x1f   : > { %417 = vperm.xlu1 %1550, %v311_v17   ;;  %337 = vperm.xlu0 %1549, %v295_v18   ;;  %v305_v38 = vld [vmem:[%s1725_s17 + $0x60] sm:$0xff]  ;;  %v306_v40 = vld [vmem:[%s1725_s17 + $0x68] sm:$0xff]  ;;  %v307_v42 = vld [vmem:[%s1725_s17 + $0x70] sm:$0xff] }
  0x20   : > { %v324_v43 = vld [vmem:[%s1725_s17 + $0xf8] sm:$0xff]  ;;  %v262_v45 = vld [vmem:[%s1770_s29 + $0x8] sm:$0xff]  ;;  %v261_v46 = vld [vmem:[%s1770_s29] sm:$0xff] }
  0x21   : > { %v308_v44 = vld [vmem:[%s1725_s17 + $0x78] sm:$0xff]  ;;  %v278_v51 = vld [vmem:[%s1770_s29 + $0x88] sm:$0xff]  ;;  %v277_v52 = vld [vmem:[%s1770_s29 + $0x80] sm:$0xff] }
  0x22   : > { %v279_v57 = vld [vmem:[%s1770_s29 + $0x90] sm:$0xff]  ;;  %v280_v63 = vld [vmem:[%s1770_s29 + $0x98] sm:$0xff]  ;;  %v281_v5 = vld [vmem:[%s1770_s29 + $0xa0] sm:$0xff] }
  0x23   : > { %422 = vperm.xlu1 %1550, %v312_v19   ;;  %342 = vperm.xlu0 %1549, %v296_v20   ;;  %v263_v58 = vld [vmem:[%s1770_s29 + $0x10] sm:$0xff]  ;;  %v264_v0 = vld [vmem:[%s1770_s29 + $0x18] sm:$0xff]  ;;  %v265_v6 = vld [vmem:[%s1770_s29 + $0x20] sm:$0xff] }
  0x24   : > { %v282_v11 = vld [vmem:[%s1770_s29 + $0xa8] sm:$0xff]  ;;  %v283_v17 = vld [vmem:[%s1770_s29 + $0xb0] sm:$0xff] }
  0x25   : > { %v266_v12 = vld [vmem:[%s1770_s29 + $0x28] sm:$0xff]  ;;  %v267_v18 = vld [vmem:[%s1770_s29 + $0x30] sm:$0xff] }
  0x27   : > { %427 = vperm.xlu1 %1550, %v313_v21   ;;  %347 = vperm.xlu0 %1549, %v297_v22  }
  0x2b   : > { %432 = vperm.xlu1 %1550, %v314_v23   ;;  %352 = vperm.xlu0 %1549, %v298_v24   ;;  %v284_v23 = vld [vmem:[%s1770_s29 + $0xb8] sm:$0xff] }
  0x2c   : > { %v268_v24 = vld [vmem:[%s1770_s29 + $0x38] sm:$0xff] }
  0x2f   : > { %437 = vperm.xlu1 %1550, %v315_v25   ;;  %357 = vperm.xlu0 %1549, %v299_v26  }
  0x33   : > { %442 = vperm.xlu1 %1550, %v316_v27   ;;  %362 = vperm.xlu0 %1549, %v300_v28  }
  0x37   : > { %447 = vperm.xlu1 %1550, %v317_v29   ;;  %367 = vperm.xlu0 %1549, %v301_v30   ;;  %v285_v29 = vld [vmem:[%s1770_s29 + $0xc0] sm:$0xff] }
  0x38   : > { %v269_v30 = vld [vmem:[%s1770_s29 + $0x40] sm:$0xff] }
  0x3b   : > { %452 = vperm.xlu1 %1550, %v318_v31   ;;  %372 = vperm.xlu0 %1549, %v302_v32  }
  0x3f   : > { %457 = vperm.xlu1 %1550, %v319_v33   ;;  %377 = vperm.xlu0 %1549, %v303_v34  }
  0x43   : > { %462 = vperm.xlu1 %1550, %v320_v35   ;;  %382 = vperm.xlu0 %1549, %v304_v36   ;;  %v286_v35 = vld [vmem:[%s1770_s29 + $0xc8] sm:$0xff] }
  0x44   : > { %v270_v36 = vld [vmem:[%s1770_s29 + $0x48] sm:$0xff] }
  0x47   : > { %467 = vperm.xlu1 %1550, %v321_v37   ;;  %387 = vperm.xlu0 %1549, %v305_v38  }
  0x4b   : > { %472 = vperm.xlu1 %1550, %v322_v39   ;;  %392 = vperm.xlu0 %1549, %v306_v40  }
  0x4f   : > { %477 = vperm.xlu1 %1550, %v323_v41   ;;  %397 = vperm.xlu0 %1549, %v307_v42   ;;  %v287_v41 = vld [vmem:[%s1770_s29 + $0xd0] sm:$0xff] }
  0x50   : > { %v271_v42 = vld [vmem:[%s1770_s29 + $0x50] sm:$0xff] }
  0x53   : > { %482 = vperm.xlu1 %1550, %v324_v43   ;;  %402 = vperm.xlu0 %1549, %v308_v44  }
  0x96   : > { %v333_v47 = vpop.permute.xlu1 %332  ;;  %v328_v48 = vpop.permute.xlu0 %327 }
  0x97   : > { %v486_v49 = vmul.f32 %v333_v47, %v262_v45  ;;  %v485_v50 = vmul.f32 %v328_v48, %v261_v46  ;;  %v288_v47 = vld [vmem:[%s1770_s29 + $0xd8] sm:$0xff] }
  0x98   : > { %v272_v48 = vld [vmem:[%s1770_s29 + $0x58] sm:$0xff] }
  0x99   : > { %1388 = vmatprep.mubr.msk.f32.mxu0 %vm532_vm0, %v485_v50 }
  0x9a   : > { %v413_v53 = vpop.permute.xlu1 %412  ;;  %v408_v54 = vpop.permute.xlu0 %407  ;;  %1389 = vmatmul.mubr.msk.f32.vlgmr.msra.gmra.mrb[0].mxu0 %vm532_vm0, %v486_v49 }
  0x9b   : > { %v502_v55 = vmul.f32 %v413_v53, %v278_v51  ;;  %v501_v56 = vmul.f32 %v408_v54, %v277_v52  ;;  %v289_v53 = vld [vmem:[%s1770_s29 + $0xe0] sm:$0xff] }
  0x9c   : > { %v273_v54 = vld [vmem:[%s1770_s29 + $0x60] sm:$0xff] }
  0x9d   : > { %1412 = vmatprep.mubr.msk.f32.mxu1 %vm532_vm0, %v501_v56 }
  0x9e   : > { %v418_v59 = vpop.permute.xlu1 %417  ;;  %v338_v60 = vpop.permute.xlu0 %337  ;;  %1413 = vmatmul.mubr.msk.f32.vlgmr.msra.gmra.mrb[0].mxu1 %vm532_vm0, %v502_v55 }
  0x9f   : > { %v503_v61 = vmul.f32 %v418_v59, %v279_v57  ;;  %v487_v62 = vmul.f32 %v338_v60, %v263_v58  ;;  %v290_v59 = vld [vmem:[%s1770_s29 + $0xe8] sm:$0xff] }
  0xa0   : > { %v274_v60 = vld [vmem:[%s1770_s29 + $0x68] sm:$0xff] }
  0xa1   : > { %1391 = vmatprep.mubr.msk.f32.mxu0 %vm532_vm0, %v487_v62  ;;  %1415 = vmatprep.mubr.msk.f32.mxu1 %vm532_vm0, %v503_v61 }
  0xa2   : > { %v423_v1 = vpop.permute.xlu1 %422  ;;  %v343_v2 = vpop.permute.xlu0 %342 }
  0xa3   : > { %v504_v3 = vmul.f32 %v423_v1, %v280_v63  ;;  %v488_v4 = vmul.f32 %v343_v2, %v264_v0  ;;  %v291_v1 = vld [vmem:[%s1770_s29 + $0xf0] sm:$0xff] }
  0xa4   : > { %v275_v2 = vld [vmem:[%s1770_s29 + $0x70] sm:$0xff] }
  0xa5   : > { %1392 = vmatmul.mubr.msk.f32.gmra.mrb[2].mxu0 %vm532_vm0, %v488_v4  ;;  %1416 = vmatmul.mubr.msk.f32.gmra.mrb[2].mxu1 %vm532_vm0, %v504_v3 }
  0xa6   : > { %v428_v7 = vpop.permute.xlu1 %427  ;;  %v348_v8 = vpop.permute.xlu0 %347 }
  0xa7   : > { %v505_v9 = vmul.f32 %v428_v7, %v281_v5  ;;  %v489_v10 = vmul.f32 %v348_v8, %v265_v6  ;;  %v292_v7 = vld [vmem:[%s1770_s29 + $0xf8] sm:$0xff] }
  0xa8   : > { %v276_v8 = vld [vmem:[%s1770_s29 + $0x78] sm:$0xff] }
  0xa9   : > { %1394 = vmatprep.mubr.msk.f32.mxu0 %vm532_vm0, %v489_v10  ;;  %1418 = vmatprep.mubr.msk.f32.mxu1 %vm532_vm0, %v505_v9 }
  0xaa   : > { %v433_v13 = vpop.permute.xlu1 %432  ;;  %v353_v14 = vpop.permute.xlu0 %352 }
  0xab   : > { %v506_v15 = vmul.f32 %v433_v13, %v282_v11  ;;  %v490_v16 = vmul.f32 %v353_v14, %v266_v12  ;;  %v1840_v13 = vld [vmem:[%s2082_s3] ss:$0 sm:$0xff] }
  0xad   : > { %1395 = vmatmul.mubr.msk.f32.gmra.mrb[4].mxu0 %vm532_vm0, %v490_v16  ;;  %1419 = vmatmul.mubr.msk.f32.gmra.mrb[4].mxu1 %vm532_vm0, %v506_v15 }
  0xae   : > { %v438_v19 = vpop.permute.xlu1 %437  ;;  %v358_v20 = vpop.permute.xlu0 %357 }
  0xaf   : > { %v507_v21 = vmul.f32 %v438_v19, %v283_v17  ;;  %v491_v22 = vmul.f32 %v358_v20, %v267_v18 }
  0xb1   : > { %1397 = vmatprep.mubr.msk.f32.mxu0 %vm532_vm0, %v491_v22  ;;  %1421 = vmatprep.mubr.msk.f32.mxu1 %vm532_vm0, %v507_v21 }
  0xb2   : > { %v443_v25 = vpop.permute.xlu1 %442  ;;  %v363_v26 = vpop.permute.xlu0 %362 }
  0xb3   : > { %v508_v27 = vmul.f32 %v443_v25, %v284_v23  ;;  %v492_v28 = vmul.f32 %v363_v26, %v268_v24 }
  0xb5   : > { %1398 = vmatmul.mubr.msk.f32.gmra.mrb[6].mxu0 %vm532_vm0, %v492_v28  ;;  %1422 = vmatmul.mubr.msk.f32.gmra.mrb[6].mxu1 %vm532_vm0, %v508_v27 }
  0xb6   : > { %v448_v31 = vpop.permute.xlu1 %447  ;;  %v368_v32 = vpop.permute.xlu0 %367 }
  0xb7   : > { %v509_v33 = vmul.f32 %v448_v31, %v285_v29  ;;  %v493_v34 = vmul.f32 %v368_v32, %v269_v30 }
  0xb9   : > { %1400 = vmatprep.mubr.msk.f32.mxu0 %vm532_vm0, %v493_v34  ;;  %1424 = vmatprep.mubr.msk.f32.mxu1 %vm532_vm0, %v509_v33 }
  0xba   : > { %v453_v37 = vpop.permute.xlu1 %452  ;;  %v373_v38 = vpop.permute.xlu0 %372 }
  0xbb   : > { %v510_v39 = vmul.f32 %v453_v37, %v286_v35  ;;  %v494_v40 = vmul.f32 %v373_v38, %v270_v36 }
  0xbd   : > { %1401 = vmatmul.mubr.msk.f32.gmra.mrb[8].mxu0 %vm532_vm0, %v494_v40  ;;  %1425 = vmatmul.mubr.msk.f32.gmra.mrb[8].mxu1 %vm532_vm0, %v510_v39 }
  0xbe   : > { %v458_v43 = vpop.permute.xlu1 %457  ;;  %v378_v44 = vpop.permute.xlu0 %377 }
  0xbf   : > { %v511_v45 = vmul.f32 %v458_v43, %v287_v41  ;;  %v495_v46 = vmul.f32 %v378_v44, %v271_v42 }
  0xc1   : > { %1403 = vmatprep.mubr.msk.f32.mxu0 %vm532_vm0, %v495_v46  ;;  %1427 = vmatprep.mubr.msk.f32.mxu1 %vm532_vm0, %v511_v45 }
  0xc2   : > { %v463_v49 = vpop.permute.xlu1 %462  ;;  %v383_v50 = vpop.permute.xlu0 %382 }
  0xc3   : > { %v512_v51 = vmul.f32 %v463_v49, %v288_v47  ;;  %v496_v52 = vmul.f32 %v383_v50, %v272_v48 }
  0xc5   : > { %1404 = vmatmul.mubr.msk.f32.gmra.mrb[10].mxu0 %vm532_vm0, %v496_v52  ;;  %1428 = vmatmul.mubr.msk.f32.gmra.mrb[10].mxu1 %vm532_vm0, %v512_v51 }
  0xc6   : > { %v468_v55 = vpop.permute.xlu1 %467  ;;  %v388_v56 = vpop.permute.xlu0 %387 }
  0xc7   : > { %v513_v57 = vmul.f32 %v468_v55, %v289_v53  ;;  %v497_v58 = vmul.f32 %v388_v56, %v273_v54 }
  0xc9   : > { %1406 = vmatprep.mubr.msk.f32.mxu0 %vm532_vm0, %v497_v58  ;;  %1430 = vmatprep.mubr.msk.f32.mxu1 %vm532_vm0, %v513_v57 }
  0xca   : > { %v473_v61 = vpop.permute.xlu1 %472  ;;  %v393_v62 = vpop.permute.xlu0 %392 }
  0xcb   : > { %v514_v63 = vmul.f32 %v473_v61, %v290_v59  ;;  %v498_v0 = vmul.f32 %v393_v62, %v274_v60 }
  0xcd   : > { %1407 = vmatmul.mubr.msk.f32.gmra.mrb[12].mxu0 %vm532_vm0, %v498_v0  ;;  %1431 = vmatmul.mubr.msk.f32.gmra.mrb[12].mxu1 %vm532_vm0, %v514_v63 }
  0xce   : > { %v478_v3 = vpop.permute.xlu1 %477  ;;  %v398_v4 = vpop.permute.xlu0 %397 }
  0xcf   : > { %v515_v5 = vmul.f32 %v478_v3, %v291_v1  ;;  %v499_v6 = vmul.f32 %v398_v4, %v275_v2 }
  0xd1   : > { %1409 = vmatprep.mubr.msk.f32.mxu0 %vm532_vm0, %v499_v6  ;;  %1433 = vmatprep.mubr.msk.f32.mxu1 %vm532_vm0, %v515_v5 }
  0xd2   : > { %v483_v9 = vpop.permute.xlu1 %482  ;;  %v403_v10 = vpop.permute.xlu0 %402 }
  0xd3   : > { %v516_v11 = vmul.f32 %v483_v9, %v292_v7  ;;  %v500_v12 = vmul.f32 %v403_v10, %v276_v8 }
  0xd5   : > { %1410 = vmatmul.mubr.msk.f32.gmra.mrb[14].mxu0 %vm532_vm0, %v500_v12  ;;  %1434 = vmatmul.mubr.msk.f32.gmra.mrb[14].mxu1 %vm532_vm0, %v516_v11 }
 0x16d   : > { %v1390_v14 = vpop.f32.mrb[0].mxu0 }
 0x16e   : > { %v701_v15 = vadd.f32 %v1390_v14, %v1840_v13  ;;  %v695_v16 = vpop.f32.mrb[1].mxu0 }
 0x16f   : > { %v696_v17 = vadd.f32 %v1840_v13, %v695_v16 }
 0x170   : > { %v855_v18 = vmax.f32 %v701_v15, 0.0 }
 0x171   : > { %v854_v19 = vmax.f32 %v696_v17, 0.0  ;;  %v1414_v20 = vpop.f32.mrb[0].mxu1 }
 0x172   : > { %888 = vst.msk [vmem:[%s1844_s8 + $0x8] sm:$0xff] %vm886_vm1, %v855_v18  ;;  %v781_v21 = vadd.f32 %v1414_v20, %v1840_v13  ;;  %v775_v22 = vpop.f32.mrb[1].mxu1 }
 0x173   : > { %887 = vst.msk [vmem:[%s1844_s8] sm:$0xff] %vm886_vm1, %v854_v19  ;;  %v776_v23 = vadd.f32 %v1840_v13, %v775_v22 }
 0x174   : > { %v871_v24 = vmax.f32 %v781_v21, 0.0 }
 0x175   : > { %v870_v25 = vmax.f32 %v776_v23, 0.0 }
 0x176   : > { %904 = vst.msk [vmem:[%s1844_s8 + $0x88] sm:$0xff] %vm886_vm1, %v871_v24 }
 0x177   : > { %903 = vst.msk [vmem:[%s1844_s8 + $0x80] sm:$0xff] %vm886_vm1, %v870_v25 }
 0x178   : > { %v1393_v26 = vpop.f32.mrb[2].mxu0  ;;  %v1417_v27 = vpop.f32.mrb[2].mxu1 }
 0x179   : > { %v711_v28 = vadd.f32 %v1393_v26, %v1840_v13  ;;  %v791_v29 = vadd.f32 %v1417_v27, %v1840_v13  ;;  %v705_v30 = vpop.f32.mrb[3].mxu0  ;;  %v785_v31 = vpop.f32.mrb[3].mxu1 }
 0x17a   : > { %v706_v32 = vadd.f32 %v1840_v13, %v705_v30  ;;  %v786_v33 = vadd.f32 %v1840_v13, %v785_v31 }
 0x17b   : > { %v857_v34 = vmax.f32 %v711_v28, 0.0  ;;  %v873_v35 = vmax.f32 %v791_v29, 0.0 }
 0x17c   : > { %v856_v36 = vmax.f32 %v706_v32, 0.0  ;;  %v872_v37 = vmax.f32 %v786_v33, 0.0 }
 0x17d   : > { %890 = vst.msk [vmem:[%s1844_s8 + $0x18] sm:$0xff] %vm886_vm1, %v857_v34  ;;  %906 = vst.msk [vmem:[%s1844_s8 + $0x98] sm:$0xff] %vm886_vm1, %v873_v35 }
 0x17e   : > { %889 = vst.msk [vmem:[%s1844_s8 + $0x10] sm:$0xff] %vm886_vm1, %v856_v36  ;;  %905 = vst.msk [vmem:[%s1844_s8 + $0x90] sm:$0xff] %vm886_vm1, %v872_v37 }
 0x180   : > { %v1396_v38 = vpop.f32.mrb[4].mxu0  ;;  %v1420_v39 = vpop.f32.mrb[4].mxu1 }
 0x181   : > { %v721_v40 = vadd.f32 %v1396_v38, %v1840_v13  ;;  %v801_v41 = vadd.f32 %v1420_v39, %v1840_v13  ;;  %v715_v42 = vpop.f32.mrb[5].mxu0  ;;  %v795_v43 = vpop.f32.mrb[5].mxu1 }
 0x182   : > { %v716_v44 = vadd.f32 %v1840_v13, %v715_v42  ;;  %v796_v45 = vadd.f32 %v1840_v13, %v795_v43 }
 0x183   : > { %v859_v46 = vmax.f32 %v721_v40, 0.0  ;;  %v875_v47 = vmax.f32 %v801_v41, 0.0 }
 0x184   : > { %v858_v48 = vmax.f32 %v716_v44, 0.0  ;;  %v874_v49 = vmax.f32 %v796_v45, 0.0 }
 0x185   : > { %892 = vst.msk [vmem:[%s1844_s8 + $0x28] sm:$0xff] %vm886_vm1, %v859_v46  ;;  %908 = vst.msk [vmem:[%s1844_s8 + $0xa8] sm:$0xff] %vm886_vm1, %v875_v47 }
 0x186   : > { %891 = vst.msk [vmem:[%s1844_s8 + $0x20] sm:$0xff] %vm886_vm1, %v858_v48  ;;  %907 = vst.msk [vmem:[%s1844_s8 + $0xa0] sm:$0xff] %vm886_vm1, %v874_v49 }
 0x188   : > { %v1399_v50 = vpop.f32.mrb[6].mxu0  ;;  %v1423_v51 = vpop.f32.mrb[6].mxu1 }
 0x189   : > { %v731_v52 = vadd.f32 %v1399_v50, %v1840_v13  ;;  %v811_v53 = vadd.f32 %v1423_v51, %v1840_v13  ;;  %v725_v54 = vpop.f32.mrb[7].mxu0  ;;  %v805_v55 = vpop.f32.mrb[7].mxu1 }
 0x18a   : > { %v726_v56 = vadd.f32 %v1840_v13, %v725_v54  ;;  %v806_v57 = vadd.f32 %v1840_v13, %v805_v55 }
 0x18b   : > { %v861_v58 = vmax.f32 %v731_v52, 0.0  ;;  %v877_v59 = vmax.f32 %v811_v53, 0.0 }
 0x18c   : > { %v860_v60 = vmax.f32 %v726_v56, 0.0  ;;  %v876_v61 = vmax.f32 %v806_v57, 0.0 }
 0x18d   : > { %894 = vst.msk [vmem:[%s1844_s8 + $0x38] sm:$0xff] %vm886_vm1, %v861_v58  ;;  %910 = vst.msk [vmem:[%s1844_s8 + $0xb8] sm:$0xff] %vm886_vm1, %v877_v59 }
 0x18e   : > { %893 = vst.msk [vmem:[%s1844_s8 + $0x30] sm:$0xff] %vm886_vm1, %v860_v60  ;;  %909 = vst.msk [vmem:[%s1844_s8 + $0xb0] sm:$0xff] %vm886_vm1, %v876_v61 }
 0x190   : > { %v1402_v62 = vpop.f32.mrb[8].mxu0  ;;  %v1426_v63 = vpop.f32.mrb[8].mxu1 }
 0x191   : > { %v741_v0 = vadd.f32 %v1402_v62, %v1840_v13  ;;  %v821_v1 = vadd.f32 %v1426_v63, %v1840_v13  ;;  %v735_v2 = vpop.f32.mrb[9].mxu0  ;;  %v815_v3 = vpop.f32.mrb[9].mxu1 }
 0x192   : > { %v736_v4 = vadd.f32 %v1840_v13, %v735_v2  ;;  %v816_v5 = vadd.f32 %v1840_v13, %v815_v3 }
 0x193   : > { %v863_v6 = vmax.f32 %v741_v0, 0.0  ;;  %v879_v7 = vmax.f32 %v821_v1, 0.0 }
 0x194   : > { %v862_v8 = vmax.f32 %v736_v4, 0.0  ;;  %v878_v9 = vmax.f32 %v816_v5, 0.0 }
 0x195   : > { %896 = vst.msk [vmem:[%s1844_s8 + $0x48] sm:$0xff] %vm886_vm1, %v863_v6  ;;  %912 = vst.msk [vmem:[%s1844_s8 + $0xc8] sm:$0xff] %vm886_vm1, %v879_v7 }
 0x196   : > { %895 = vst.msk [vmem:[%s1844_s8 + $0x40] sm:$0xff] %vm886_vm1, %v862_v8  ;;  %911 = vst.msk [vmem:[%s1844_s8 + $0xc0] sm:$0xff] %vm886_vm1, %v878_v9 }
 0x198   : > { %v1405_v10 = vpop.f32.mrb[10].mxu0  ;;  %v1429_v11 = vpop.f32.mrb[10].mxu1 }
 0x199   : > { %v751_v12 = vadd.f32 %v1405_v10, %v1840_v13  ;;  %v831_v14 = vadd.f32 %v1429_v11, %v1840_v13  ;;  %v745_v15 = vpop.f32.mrb[11].mxu0  ;;  %v825_v16 = vpop.f32.mrb[11].mxu1 }
 0x19a   : > { %v746_v17 = vadd.f32 %v1840_v13, %v745_v15  ;;  %v826_v18 = vadd.f32 %v1840_v13, %v825_v16 }
 0x19b   : > { %v865_v19 = vmax.f32 %v751_v12, 0.0  ;;  %v881_v20 = vmax.f32 %v831_v14, 0.0 }
 0x19c   : > { %v864_v21 = vmax.f32 %v746_v17, 0.0  ;;  %v880_v22 = vmax.f32 %v826_v18, 0.0 }
 0x19d   : > { %898 = vst.msk [vmem:[%s1844_s8 + $0x58] sm:$0xff] %vm886_vm1, %v865_v19  ;;  %914 = vst.msk [vmem:[%s1844_s8 + $0xd8] sm:$0xff] %vm886_vm1, %v881_v20 }
 0x19e   : > { %897 = vst.msk [vmem:[%s1844_s8 + $0x50] sm:$0xff] %vm886_vm1, %v864_v21  ;;  %913 = vst.msk [vmem:[%s1844_s8 + $0xd0] sm:$0xff] %vm886_vm1, %v880_v22 }
 0x1a0   : > { %v1408_v23 = vpop.f32.mrb[12].mxu0  ;;  %v1432_v24 = vpop.f32.mrb[12].mxu1 }
 0x1a1   : > { %v761_v25 = vadd.f32 %v1408_v23, %v1840_v13  ;;  %v841_v26 = vadd.f32 %v1432_v24, %v1840_v13  ;;  %v755_v27 = vpop.f32.mrb[13].mxu0  ;;  %v835_v28 = vpop.f32.mrb[13].mxu1 }
 0x1a2   : > { %v756_v29 = vadd.f32 %v1840_v13, %v755_v27  ;;  %v836_v30 = vadd.f32 %v1840_v13, %v835_v28 }
 0x1a3   : > { %v867_v31 = vmax.f32 %v761_v25, 0.0  ;;  %v883_v32 = vmax.f32 %v841_v26, 0.0 }
 0x1a4   : > { %v866_v33 = vmax.f32 %v756_v29, 0.0  ;;  %v882_v34 = vmax.f32 %v836_v30, 0.0 }
 0x1a5   : > { %900 = vst.msk [vmem:[%s1844_s8 + $0x68] sm:$0xff] %vm886_vm1, %v867_v31  ;;  %916 = vst.msk [vmem:[%s1844_s8 + $0xe8] sm:$0xff] %vm886_vm1, %v883_v32 }
 0x1a6   : > { %899 = vst.msk [vmem:[%s1844_s8 + $0x60] sm:$0xff] %vm886_vm1, %v866_v33  ;;  %915 = vst.msk [vmem:[%s1844_s8 + $0xe0] sm:$0xff] %vm886_vm1, %v882_v34 }
 0x1a8   : > { %v1411_v35 = vpop.f32.mrb[14].mxu0  ;;  %v1435_v36 = vpop.f32.mrb[14].mxu1  ;;  %925 = sbr.rel (!%p1690_p4) target bundleno = 487 (0x1e7), region = 40 }
 0x1a9   : > { %v771_v37 = vadd.f32 %v1411_v35, %v1840_v13  ;;  %v851_v38 = vadd.f32 %v1435_v36, %v1840_v13  ;;  %v765_v39 = vpop.f32.mrb[15].mxu0  ;;  %v845_v40 = vpop.f32.mrb[15].mxu1 }
 0x1aa   : > { %v766_v41 = vadd.f32 %v1840_v13, %v765_v39  ;;  %v846_v42 = vadd.f32 %v1840_v13, %v845_v40 }
 0x1ab   : > { %v869_v43 = vmax.f32 %v771_v37, 0.0  ;;  %v885_v44 = vmax.f32 %v851_v38, 0.0 }
 0x1ac   : > { %v868_v45 = vmax.f32 %v766_v41, 0.0  ;;  %v884_v46 = vmax.f32 %v846_v42, 0.0 }
 0x1ad   : > { %902 = vst.msk [vmem:[%s1844_s8 + $0x78] sm:$0xff] %vm886_vm1, %v869_v43  ;;  %918 = vst.msk [vmem:[%s1844_s8 + $0xf8] sm:$0xff] %vm886_vm1, %v885_v44 }
 0x1ae   : > { %901 = vst.msk [vmem:[%s1844_s8 + $0x70] sm:$0xff] %vm886_vm1, %v868_v45  ;;  %917 = vst.msk [vmem:[%s1844_s8 + $0xf0] sm:$0xff] %vm886_vm1, %v884_v46 }
 0x1af   : > { %s2094_s15 = smov (!%p928_p8, %s927_s15), 32 }
 0x1b0   : > { %s1314_s13 = sshll.u32 %s2094_s15, 7 }
 0x1b1   : > { %p1317_p9 = scmp.eq.s32.totalorder %s1314_s13, 0 }
 0x1b2   : > { %s1953_s14 = sshrl.u32 (!%p1317_p9), %s2094_s15, 5 }
 0x1b3   : > { %936 = sbr.rel (%p1317_p9) target bundleno = 487 (0x1e7), region = 44  ;;  %p1318_p10 = scmp.le.s32.totalorder (!%p1317_p9), %s1953_s14, 0 }
 0x1ba   : > { %1220 = sbr.rel (%p1318_p10) target bundleno = 466 (0x1d2), region = 123  ;;  %s2085_s18 = smov (!%p1318_p10), %s1947_s12 }
 0x1bb   : > { %s2086_s23 = smov (!%p1318_p10), %s1844_s8  ;;  %s1962_s24 = smov (!%p1318_p10), 0  }
 0x1bc   : > { %s1964_s17 = smov (!%p1318_p10), 0  }
 0x1c1 LB: >> { %v1060_v13 = vld [vmem:[%s1613_s23] sm:$0xff]  ;;  %v1062_v47 = vld [vmem:[%s1613_s23 + $0x8] sm:$0xff]  ;;  %v1064_v48 = vld [vmem:[%s1613_s23 + $0x10] sm:$0xff]  ;;  %s1124_s20 = sadd.s32 1, %s1617_s24  ;;  %s1054_s17 = sadd.s32 1, %s1621_s17   ;;  %s1621_s17 = sphi %s1964_s17, %s1054_s17   ;;  %s1617_s24 = sphi %s1962_s24, %s2089_s24   ;;  %s1613_s23 = sphi %s2086_s23, %s2088_s23   ;;  %s1609_s18 = sphi %s2085_s18, %s2087_s18  }
 0x1c2   : >> { %1061 = vst [vmem:[%s1609_s18] sm:$0xff] %v1060_v13  ;;  %1063 = vst [vmem:[%s1609_s18 + $0x8] sm:$0xff] %v1062_v47  ;;  %v1066_v49 = vld [vmem:[%s1613_s23 + $0x18] sm:$0xff]  ;;  %v1068_v50 = vld [vmem:[%s1613_s23 + $0x20] sm:$0xff]  ;;  %p1125_p11 = scmp.ge.s32.totalorder %s1124_s20, %s1953_s14  ;;  %p1053_p12 = scmp.ge.s32.totalorder %s1054_s17, %s1953_s14 }
 0x1c3   : >> { %1065 = vst [vmem:[%s1609_s18 + $0x10] sm:$0xff] %v1064_v48  ;;  %v1070_v51 = vld [vmem:[%s1613_s23 + $0x28] sm:$0xff]  ;;  %1067 = vst [vmem:[%s1609_s18 + $0x18] sm:$0xff] %v1066_v49  ;;  %v1072_v52 = vld [vmem:[%s1613_s23 + $0x30] sm:$0xff] }
 0x1c4   : >> { %1069 = vst [vmem:[%s1609_s18 + $0x20] sm:$0xff] %v1068_v50  ;;  %1071 = vst [vmem:[%s1609_s18 + $0x28] sm:$0xff] %v1070_v51  ;;  %v1074_v53 = vld [vmem:[%s1613_s23 + $0x38] sm:$0xff]  ;;  %v1076_v54 = vld [vmem:[%s1613_s23 + $0x40] sm:$0xff]  ;;  %s2096_s20 = smov (%p1125_p11, %s1124_s20), 0 }
 0x1c5   : >> { %1073 = vst [vmem:[%s1609_s18 + $0x30] sm:$0xff] %v1072_v52  ;;  %1075 = vst [vmem:[%s1609_s18 + $0x38] sm:$0xff] %v1074_v53  ;;  %v1078_v55 = vld [vmem:[%s1613_s23 + $0x48] sm:$0xff]  ;;  %v1080_v56 = vld [vmem:[%s1613_s23 + $0x50] sm:$0xff]  ;;  %s1319_s21 = sshll.u32 %s2096_s20, 8  ;;  %s2089_s24 = smov %s2096_s20 }
 0x1c6   : >> { %1077 = vst [vmem:[%s1609_s18 + $0x40] sm:$0xff] %v1076_v54  ;;  %v1082_v57 = vld [vmem:[%s1613_s23 + $0x58] sm:$0xff]  ;;  %1079 = vst [vmem:[%s1609_s18 + $0x48] sm:$0xff] %v1078_v55  ;;  %v1084_v58 = vld [vmem:[%s1613_s23 + $0x60] sm:$0xff]  ;;  %s2020_s25 = scalar_lea.vmem %s1844_s8, %s1319_s21 [#allocation2]   ;;  %s1130_s26 = scalar_lea.vmem %s1947_s12, %s1319_s21  }
 0x1c7   : >> { %1081 = vst [vmem:[%s1609_s18 + $0x50] sm:$0xff] %v1080_v56  ;;  %1083 = vst [vmem:[%s1609_s18 + $0x58] sm:$0xff] %v1082_v57  ;;  %v1086_v59 = vld [vmem:[%s1613_s23 + $0x68] sm:$0xff]  ;;  %v1088_v60 = vld [vmem:[%s1613_s23 + $0x70] sm:$0xff] }
 0x1c8   : >> { %1085 = vst [vmem:[%s1609_s18 + $0x60] sm:$0xff] %v1084_v58  ;;  %1087 = vst [vmem:[%s1609_s18 + $0x68] sm:$0xff] %v1086_v59  ;;  %v1090_v61 = vld [vmem:[%s1613_s23 + $0x78] sm:$0xff]  ;;  %v1092_v62 = vld [vmem:[%s1613_s23 + $0x80] sm:$0xff] }
 0x1c9   : >> { %1089 = vst [vmem:[%s1609_s18 + $0x70] sm:$0xff] %v1088_v60  ;;  %v1094_v63 = vld [vmem:[%s1613_s23 + $0x88] sm:$0xff]  ;;  %1091 = vst [vmem:[%s1609_s18 + $0x78] sm:$0xff] %v1090_v61  ;;  %v1096_v0 = vld [vmem:[%s1613_s23 + $0x90] sm:$0xff] }
 0x1ca   : >> { %1093 = vst [vmem:[%s1609_s18 + $0x80] sm:$0xff] %v1092_v62  ;;  %1095 = vst [vmem:[%s1609_s18 + $0x88] sm:$0xff] %v1094_v63  ;;  %v1098_v1 = vld [vmem:[%s1613_s23 + $0x98] sm:$0xff]  ;;  %v1100_v2 = vld [vmem:[%s1613_s23 + $0xa0] sm:$0xff] }
 0x1cb   : >> { %1097 = vst [vmem:[%s1609_s18 + $0x90] sm:$0xff] %v1096_v0  ;;  %1099 = vst [vmem:[%s1609_s18 + $0x98] sm:$0xff] %v1098_v1  ;;  %v1102_v3 = vld [vmem:[%s1613_s23 + $0xa8] sm:$0xff]  ;;  %v1104_v4 = vld [vmem:[%s1613_s23 + $0xb0] sm:$0xff]  ;;  %1056 = sbr.rel (!%p1053_p12) target bundleno = 449 (0x1c1), region = 129 }
 0x1cc   : >> { %1101 = vst [vmem:[%s1609_s18 + $0xa0] sm:$0xff] %v1100_v2  ;;  %v1106_v5 = vld [vmem:[%s1613_s23 + $0xb8] sm:$0xff]  ;;  %1103 = vst [vmem:[%s1609_s18 + $0xa8] sm:$0xff] %v1102_v3  ;;  %v1108_v6 = vld [vmem:[%s1613_s23 + $0xc0] sm:$0xff] }
 0x1cd   : >> { %1105 = vst [vmem:[%s1609_s18 + $0xb0] sm:$0xff] %v1104_v4  ;;  %1107 = vst [vmem:[%s1609_s18 + $0xb8] sm:$0xff] %v1106_v5  ;;  %v1110_v7 = vld [vmem:[%s1613_s23 + $0xc8] sm:$0xff]  ;;  %v1112_v8 = vld [vmem:[%s1613_s23 + $0xd0] sm:$0xff] }
 0x1ce   : >> { %1109 = vst [vmem:[%s1609_s18 + $0xc0] sm:$0xff] %v1108_v6  ;;  %1111 = vst [vmem:[%s1609_s18 + $0xc8] sm:$0xff] %v1110_v7  ;;  %v1114_v9 = vld [vmem:[%s1613_s23 + $0xd8] sm:$0xff]  ;;  %v1116_v10 = vld [vmem:[%s1613_s23 + $0xe0] sm:$0xff] }
 0x1cf   : >> { %1113 = vst [vmem:[%s1609_s18 + $0xd0] sm:$0xff] %v1112_v8  ;;  %v1118_v11 = vld [vmem:[%s1613_s23 + $0xe8] sm:$0xff]  ;;  %1115 = vst [vmem:[%s1609_s18 + $0xd8] sm:$0xff] %v1114_v9  ;;  %v1120_v12 = vld [vmem:[%s1613_s23 + $0xf0] sm:$0xff] }
 0x1d0   : >> { %1117 = vst [vmem:[%s1609_s18 + $0xe0] sm:$0xff] %v1116_v10  ;;  %1119 = vst [vmem:[%s1609_s18 + $0xe8] sm:$0xff] %v1118_v11  ;;  %v1122_v14 = vld [vmem:[%s1613_s23 + $0xf8] sm:$0xff]  ;;  %s2088_s23 = smov %s2020_s25 }
 0x1d1   : >> { %1121 = vst [vmem:[%s1609_s18 + $0xf0] sm:$0xff] %v1120_v12  ;;  %1123 = vst [vmem:[%s1609_s18 + $0xf8] sm:$0xff] %v1122_v14  ;;  %s2087_s18 = smov %s1130_s26 }
 0x1d2 PF: > { %s2061_s27 = sand.u32 31, %s2094_s15   ;;  %s1330_s28 = sshll.u32 %s1953_s14, 8 }
 0x1d3   : > { %s1135_s29 = scalar_lea.vmem %s1844_s8, %s1330_s28 [#allocation2]   ;;  %s1137_s30 = scalar_lea.vmem %s1947_s12, %s1330_s28  }
 0x1d4   : > { %p1324_p13 = scmp.le.s32.totalorder %s2061_s27, 0 }
 0x1d5   : > { %s1623_s5 = smov (!%p1324_p13), %s1137_s30   ;;  %s1627_s6 = smov (!%p1324_p13), %s1135_s29  }
 0x1d6   : > { %1234 = sbr.rel (%p1324_p13) target bundleno = 487 (0x1e7), region = 134  ;;  %s1631_s7 = smov (!%p1324_p13), 0  }
 0x1d7   : > { %s1635_s9 = smov (!%p1324_p13), 0  }
 0x1dd LB: >> { %v1147_v15 = vld [vmem:[%s1629_s6] sm:$0xff]  ;;  %s1149_s15 = sadd.s32 1, %s1633_s7  ;;  %s1141_s9 = sadd.s32 1, %s1637_s9   ;;  %s1637_s9 = sphi %s1635_s9, %s1141_s9   ;;  %s1633_s7 = sphi %s1631_s7, %s1632_s7   ;;  %s1629_s6 = sphi %s1627_s6, %s1154_s6   ;;  %s1625_s5 = sphi %s1623_s5, %s1155_s5  }
 0x1de   : >> { %1148 = vst [vmem:[%s1625_s5] sm:$0xff] %v1147_v15  ;;  %p1150_p0 = scmp.ge.s32.totalorder %s1149_s15, %s2061_s27  ;;  %p1140_p1 = scmp.ge.s32.totalorder %s1141_s9, %s2061_s27 }
 0x1e0   : >> { %s2098_s15 = smov (%p1150_p0, %s1149_s15), 0  ;;  %1143 = sbr.rel (!%p1140_p1) target bundleno = 477 (0x1dd), region = 140 }
 0x1e1   : >> { %s1325_s8 = sshll.u32 %s2098_s15, 3  ;;  %s1632_s7 = smov %s2098_s15  }
 0x1e2   : >> { %s1154_s6 = scalar_lea.vmem %s1135_s29, %s1325_s8 [#allocation2]   ;;  %s1155_s5 = scalar_lea.vmem %s1137_s30, %s1325_s8  }
 0x1e7 PF: > { %p11_p2 = scmp.ge.s32.totalorder %s1680_s19, 4   ;;  %s2090_s15 = smov %s1601_s16 }
 0x1e8   : > { %s2091_s16 = smov %s1688_s22  ;;  %s2092_s17 = smov %s1680_s19 }
 0x1e9   :  { %13 = sbr.rel (!%p11_p2) target bundleno = 2 (0x2), region = 151 }

</bundles_post_ra>
